<compile_context>
chip_gen: v7x
topology: tpu7x:2x2x1
jax: 0.10.0
libtpu: 0.0.40
codegen_flags: <defaults>
</compile_context>

<pallas_src>
import functools

import numpy as np

import jax
import jax.numpy as jnp
from jax import lax
from jax.experimental import pallas as pl
from jax.experimental.pallas import tpu as pltpu


# ---------------------------------------------------------------------------
# Fused kernel: qkv matmul+BN -> per-head attention -> pe (dw 3x3) + BN
#               -> residual add -> proj matmul + BN.  One image per grid step.
# ---------------------------------------------------------------------------
def _attention_kernel(x_ref, wqkv_ref, qs_ref, qb_ref, wpe_ref, pes_ref,
                      peb_ref, wproj_ref, ps_ref, pb_ref, o_ref, vpad_ref, *,
                      num_heads, key_dim, head_dim, H, W, scale):
    N = H * W
    C = num_heads * head_dim
    nk = num_heads * key_dim

    # ---- qkv 1x1 conv (bf16 MXU operands, f32 acc) + folded BN (f32) ----
    x = x_ref[0].astype(jnp.bfloat16)                         # [N, C]
    wqkv = wqkv_ref[...].astype(jnp.bfloat16)                 # [C, C+2*nk]
    qkv = jnp.dot(x, wqkv, preferred_element_type=jnp.float32)
    qkv = qkv * qs_ref[...] + qb_ref[...]                     # [N, C+2*nk] f32

    q_all = qkv[:, :nk]                                       # [N, nk]
    k_all = qkv[:, nk:2 * nk]                                 # [N, nk]
    v_all = qkv[:, 2 * nk:]                                   # [N, C]

    # ---- per-head self-attention, deferred softmax normalization ----
    heads = []
    for h in range(num_heads):
        q = q_all[:, h * key_dim:(h + 1) * key_dim].astype(jnp.bfloat16)
        k = k_all[:, h * key_dim:(h + 1) * key_dim].astype(jnp.bfloat16)
        v = v_all[:, h * head_dim:(h + 1) * head_dim].astype(jnp.bfloat16)
        s = lax.dot_general(q, k, (((1,), (1,)), ((), ())),
                            preferred_element_type=jnp.float32) * scale
        s = s - jnp.max(s, axis=-1, keepdims=True)            # f32 stability
        p = jnp.exp(s)                                         # unnormalized
        inv = pl.reciprocal(jnp.sum(p, axis=-1, keepdims=True), approx=True)
        acc = jnp.dot(p.astype(jnp.bfloat16), v,
                      preferred_element_type=jnp.float32)      # [N, hd]
        heads.append(acc * inv)
    att = jnp.concatenate(heads, axis=-1)                      # [N, C] f32

    # ---- depthwise 3x3 pe conv on V via a VMEM-padded scratch + BN ----
    vpad_ref[...] = jnp.zeros_like(vpad_ref)                   # zero border
    vpad_ref[1:H + 1, 1:W + 1, :] = v_all.reshape(H, W, C)
    pe = vpad_ref[0:H, 0:W, :] * wpe_ref[0:1, :]               # first tap
    for tap in range(1, 9):
        dh, dw = divmod(tap, 3)
        pe = pe + vpad_ref[dh:dh + H, dw:dw + W, :] * wpe_ref[tap:tap + 1, :]
    pe = pe.reshape(N, C) * pes_ref[...] + peb_ref[...]

    # ---- residual add + proj 1x1 conv (bf16 MXU, f32 acc) + BN ----
    y = (att + pe).astype(jnp.bfloat16)
    wproj = wproj_ref[...].astype(jnp.bfloat16)
    z = jnp.dot(y, wproj, preferred_element_type=jnp.float32)
    o_ref[0] = z * ps_ref[...] + pb_ref[...]


def attention_fused(x_tok, w_qkv, qs, qb, wpe9, pes, peb, w_proj, ps, pb, *,
                    num_heads, key_dim, head_dim, H, W, scale):
    B, N, C = x_tok.shape
    h_total = w_qkv.shape[1]
    kernel = functools.partial(
        _attention_kernel, num_heads=num_heads, key_dim=key_dim,
        head_dim=head_dim, H=H, W=W, scale=scale)
    return pl.pallas_call(
        kernel,
        out_shape=jax.ShapeDtypeStruct((B, N, C), jnp.float32),
        grid_spec=pltpu.PrefetchScalarGridSpec(
            num_scalar_prefetch=0,
            grid=(B,),
            in_specs=[
                pl.BlockSpec((1, N, C), lambda b: (b, 0, 0)),      # x tokens
                pl.BlockSpec((C, h_total), lambda b: (0, 0)),      # qkv weight
                pl.BlockSpec((1, h_total), lambda b: (0, 0)),      # qkv BN scale
                pl.BlockSpec((1, h_total), lambda b: (0, 0)),      # qkv BN bias
                pl.BlockSpec((9, C), lambda b: (0, 0)),            # pe taps
                pl.BlockSpec((1, C), lambda b: (0, 0)),            # pe BN scale
                pl.BlockSpec((1, C), lambda b: (0, 0)),            # pe BN bias
                pl.BlockSpec((C, C), lambda b: (0, 0)),            # proj weight
                pl.BlockSpec((1, C), lambda b: (0, 0)),            # proj BN scale
                pl.BlockSpec((1, C), lambda b: (0, 0)),            # proj BN bias
            ],
            out_specs=pl.BlockSpec((1, N, C), lambda b: (b, 0, 0)),
            scratch_shapes=[pltpu.VMEM((H + 2, W + 2, C), jnp.float32)],
        ),
        compiler_params=pltpu.CompilerParams(
            dimension_semantics=("parallel",)),   # one image per TensorCore
    )(x_tok, w_qkv, qs, qb, wpe9, pes, peb, w_proj, ps, pb)


# ---------------------------------------------------------------------------
# Forward wrapper (layout transposes + weight permutation only; no HBM
# intermediates between stages).
# ---------------------------------------------------------------------------
def _qkv_permutation(num_heads, key_dim, head_dim):
    """Map interleaved per-head [q|k|v] channels to [Q_all | K_all | V_all]."""
    g = 2 * key_dim + head_dim
    q_idx = [h * g + i for h in range(num_heads) for i in range(key_dim)]
    k_idx = [h * g + key_dim + i for h in range(num_heads) for i in range(key_dim)]
    v_idx = [h * g + 2 * key_dim + i for h in range(num_heads) for i in range(head_dim)]
    return np.asarray(q_idx + k_idx + v_idx, dtype=np.int32)


def attention_forward(x_nchw, params, num_heads, attn_ratio=0.5):
    """Pallas-backed forward of the YOLOv11 Attention module (NCHW in/out)."""
    B, C, H, W = x_nchw.shape
    head_dim = C // num_heads
    key_dim = int(head_dim * attn_ratio)
    nk = num_heads * key_dim
    h_total = C + 2 * nk
    N = H * W
    scale = float(key_dim) ** -0.5

    # NCHW -> channels-last tokens [B, N, C] (channels on the lane axis).
    x = jnp.transpose(x_nchw, (0, 2, 3, 1)).reshape(B, N, C)

    # qkv 1x1-conv weight [h_total, C]; permute output channels so the kernel
    # produces [Q_all | K_all | V_all] with V contiguous, head-major.
    perm = _qkv_permutation(num_heads, key_dim, head_dim)
    w_qkv = jnp.transpose(params["qkv"]["w"].reshape(h_total, C), (1, 0))[:, perm]
    s_qkv = params["qkv"]["scale"][perm].reshape(1, h_total)
    b_qkv = params["qkv"]["bias"][perm].reshape(1, h_total)

    wpe9 = jnp.transpose(params["pe"]["w"], (1, 2, 0)).reshape(9, C)
    w_proj = jnp.transpose(params["proj"]["w"].reshape(C, C), (1, 0))

    out = attention_fused(
        x.astype(jnp.float32),
        w_qkv.astype(jnp.float32), s_qkv.astype(jnp.float32),
        b_qkv.astype(jnp.float32),
        wpe9.astype(jnp.float32),
        params["pe"]["scale"].reshape(1, C).astype(jnp.float32),
        params["pe"]["bias"].reshape(1, C).astype(jnp.float32),
        w_proj.astype(jnp.float32),
        params["proj"]["scale"].reshape(1, C).astype(jnp.float32),
        params["proj"]["bias"].reshape(1, C).astype(jnp.float32),
        num_heads=num_heads, key_dim=key_dim, head_dim=head_dim,
        H=H, W=W, scale=scale)                                 # [B, N, C]

    return jnp.transpose(out.reshape(B, H, W, C), (0, 3, 1, 2))


# ---------------------------------------------------------------------------
# Deterministic synthetic parameters (conv weights + folded eval-mode BN)
# ---------------------------------------------------------------------------
def fold_bn(gamma, beta, mean, var, eps=1e-5):
    s = gamma / jnp.sqrt(var + eps)
    return s, beta - mean * s


def _make_conv_bn(key, cout, fan_in, wshape):
    kw, kg, kb, km, kv = jax.random.split(key, 5)
    w = jax.random.normal(kw, wshape, jnp.float32) / jnp.sqrt(float(fan_in))
    gamma = 1.0 + 0.1 * jax.random.normal(kg, (cout,), jnp.float32)
    beta = 0.1 * jax.random.normal(kb, (cout,), jnp.float32)
    mean = 0.1 * jax.random.normal(km, (cout,), jnp.float32)
    var = jnp.abs(jax.random.normal(kv, (cout,), jnp.float32)) * 0.5 + 0.5
    s, b = fold_bn(gamma, beta, mean, var)
    return {"w": w, "scale": s, "bias": b}


def make_attention_params(key, dim, num_heads, attn_ratio=0.5):
    head_dim = dim // num_heads
    key_dim = int(head_dim * attn_ratio)
    h_total = dim + 2 * num_heads * key_dim
    k1, k2, k3 = jax.random.split(key, 3)
    return {
        # Conv2d(dim, h, 1, bias=False): weight [h, dim, 1, 1] stored as [h, dim]
        "qkv": _make_conv_bn(k1, h_total, dim, (h_total, dim)),
        # Conv2d(dim, dim, 1, bias=False): weight [dim, dim]
        "proj": _make_conv_bn(k2, dim, dim, (dim, dim)),
        # depthwise Conv2d(dim, dim, 3, groups=dim): weight [dim, 1, 3, 3] -> [dim, 3, 3]
        "pe": _make_conv_bn(k3, dim, 9, (dim, 3, 3)),
    }


# ---------------------------------------------------------------------------
# Pure-JAX f32 reference (mirrors the PyTorch forward exactly)
# ---------------------------------------------------------------------------
def attention_reference(x_nchw, params, num_heads, attn_ratio=0.5):
    B, C, H, W = x_nchw.shape
    head_dim = C // num_heads
    key_dim = int(head_dim * attn_ratio)
    h_total = C + 2 * num_heads * key_dim
    N = H * W
    scale = float(key_dim) ** -0.5

    def bn(y, p):
        return y * p["scale"][None, :, None, None] + p["bias"][None, :, None, None]

    w_qkv = params["qkv"]["w"].reshape(h_total, C)
    qkv = bn(jnp.einsum("bchw,oc->bohw", x_nchw, w_qkv), params["qkv"])

    qkv = qkv.reshape(B, num_heads, 2 * key_dim + head_dim, N)
    q = qkv[:, :, :key_dim, :]
    k = qkv[:, :, key_dim:2 * key_dim, :]
    v = qkv[:, :, 2 * key_dim:, :]

    attn = jnp.einsum("bhdn,bhdm->bhnm", q, k) * scale
    attn = jax.nn.softmax(attn, axis=-1)
    x_att = jnp.einsum("bhdm,bhnm->bhdn", v, attn).reshape(B, C, H, W)

    v_img = v.reshape(B, C, H, W)
    w_pe = params["pe"]["w"].reshape(C, 1, 3, 3)
    pe = lax.conv_general_dilated(
        v_img, w_pe, (1, 1), [(1, 1), (1, 1)],
        dimension_numbers=("NCHW", "OIHW", "NCHW"), feature_group_count=C)
    pe = bn(pe, params["pe"])

    y = x_att + pe
    w_proj = params["proj"]["w"].reshape(C, C)
    return bn(jnp.einsum("bchw,oc->bohw", y, w_proj), params["proj"])


# ---------------------------------------------------------------------------
if __name__ == "__main__":
    B, dim, H, W = 2, 64, 8, 8
    num_heads = 4                     # head_dim=16, key_dim=8, qkv width=128

    key = jax.random.PRNGKey(0)
    kx, kp = jax.random.split(key)
    x = jax.random.normal(kx, (B, dim, H, W), jnp.float32)
    params = make_attention_params(kp, dim, num_heads)

    fwd = jax.jit(attention_forward, static_argnums=(2,))
    ref_fn = jax.jit(attention_reference, static_argnums=(2,))

    out = jax.block_until_ready(fwd(x, params, num_heads))
    ref = jax.block_until_ready(ref_fn(x, params, num_heads))

    assert out.shape == (B, dim, H, W)
    max_err = float(jnp.max(jnp.abs(out - ref)))
    # All MXU matmuls (qkv, q@k^T, p@v, proj) use bf16 operands vs a pure-f32
    # reference -> relaxed tolerance.
    assert jnp.allclose(out, ref, rtol=3e-2, atol=1e-1), (
        f"mismatch vs reference (max abs err {max_err:.4f})")
    print("KERNEL_OK")
</pallas_src>

<mosaic_0001>
module attributes {stable_mosaic.version = 11 : i64} {
  func.func @_attention_kernel(%arg0: i32, %arg1: memref<1x64x64xf32, #tpu.memory_space<vmem>>, %arg2: memref<64x128xf32, #tpu.memory_space<vmem>>, %arg3: memref<1x128xf32, #tpu.memory_space<vmem>>, %arg4: memref<1x128xf32, #tpu.memory_space<vmem>>, %arg5: memref<9x64xf32, #tpu.memory_space<vmem>>, %arg6: memref<1x64xf32, #tpu.memory_space<vmem>>, %arg7: memref<1x64xf32, #tpu.memory_space<vmem>>, %arg8: memref<64x64xf32, #tpu.memory_space<vmem>>, %arg9: memref<1x64xf32, #tpu.memory_space<vmem>>, %arg10: memref<1x64xf32, #tpu.memory_space<vmem>>, %arg11: memref<1x64x64xf32, #tpu.memory_space<vmem>>, %arg12: memref<10x10x64xf32, #tpu.memory_space<vmem>>) attributes {dimension_semantics = [#tpu.dimension_semantics<parallel>], iteration_bounds = array<i64: 2>, scalar_prefetch = 0 : i64, scratch_operands = 1 : i64, tpu.core_type = #tpu.core_type<tc>, window_params = [{transform_indices = @transform_0, window_bounds = array<i64: 1, 64, 64>}, {pipeline_mode = #tpu.pipeline_mode<synchronous>, transform_indices = @transform_1, window_bounds = array<i64: 64, 128>}, {pipeline_mode = #tpu.pipeline_mode<synchronous>, transform_indices = @transform_2, window_bounds = array<i64: 1, 128>}, {pipeline_mode = #tpu.pipeline_mode<synchronous>, transform_indices = @transform_3, window_bounds = array<i64: 1, 128>}, {pipeline_mode = #tpu.pipeline_mode<synchronous>, transform_indices = @transform_4, window_bounds = array<i64: 9, 64>}, {pipeline_mode = #tpu.pipeline_mode<synchronous>, transform_indices = @transform_5, window_bounds = array<i64: 1, 64>}, {pipeline_mode = #tpu.pipeline_mode<synchronous>, transform_indices = @transform_6, window_bounds = array<i64: 1, 64>}, {pipeline_mode = #tpu.pipeline_mode<synchronous>, transform_indices = @transform_7, window_bounds = array<i64: 64, 64>}, {pipeline_mode = #tpu.pipeline_mode<synchronous>, transform_indices = @transform_8, window_bounds = array<i64: 1, 64>}, {pipeline_mode = #tpu.pipeline_mode<synchronous>, transform_indices = @transform_9, window_bounds = array<i64: 1, 64>}, {transform_indices = @transform_10, window_bounds = array<i64: 1, 64, 64>}]} {
    %c0 = arith.constant 0 : index
    %c0_0 = arith.constant 0 : index
    %c0_1 = arith.constant 0 : index
    %0 = vector.load %arg1[%c0, %c0_0, %c0_1] : memref<1x64x64xf32, #tpu.memory_space<vmem>>, vector<1x64x64xf32>
    %1 = vector.shape_cast %0 : vector<1x64x64xf32> to vector<64x64xf32>
    %2 = arith.truncf %1 : vector<64x64xf32> to vector<64x64xbf16>
    %c0_2 = arith.constant 0 : index
    %c0_3 = arith.constant 0 : index
    %3 = vector.load %arg2[%c0_2, %c0_3] : memref<64x128xf32, #tpu.memory_space<vmem>>, vector<64x128xf32>
    %4 = arith.truncf %3 : vector<64x128xf32> to vector<64x128xbf16>
    %cst = arith.constant dense<0.000000e+00> : vector<64x128xf32>
    %5 = tpu.matmul %2, %4, %cst {dimension_numbers = #tpu.dot_dimension_numbers<[1], [0], [0], [1], [0, 0, 1, 1], [], []>} : vector<64x64xbf16>, vector<64x128xbf16>, vector<64x128xf32> -> vector<64x128xf32>
    %c0_4 = arith.constant 0 : index
    %c0_5 = arith.constant 0 : index
    %6 = vector.load %arg3[%c0_4, %c0_5] : memref<1x128xf32, #tpu.memory_space<vmem>>, vector<1x128xf32>
    %7 = vector.broadcast %6 : vector<1x128xf32> to vector<64x128xf32>
    %8 = arith.mulf %5, %7 : vector<64x128xf32>
    %c0_6 = arith.constant 0 : index
    %c0_7 = arith.constant 0 : index
    %9 = vector.load %arg4[%c0_6, %c0_7] : memref<1x128xf32, #tpu.memory_space<vmem>>, vector<1x128xf32>
    %10 = vector.broadcast %9 : vector<1x128xf32> to vector<64x128xf32>
    %11 = arith.addf %8, %10 : vector<64x128xf32>
    %12 = vector.extract_strided_slice %11 {offsets = [0, 0], sizes = [64, 32], strides = [1, 1]} : vector<64x128xf32> to vector<64x32xf32>
    %13 = vector.extract_strided_slice %11 {offsets = [0, 32], sizes = [64, 32], strides = [1, 1]} : vector<64x128xf32> to vector<64x32xf32>
    %14 = vector.extract_strided_slice %11 {offsets = [0, 64], sizes = [64, 64], strides = [1, 1]} : vector<64x128xf32> to vector<64x64xf32>
    %15 = vector.extract_strided_slice %12 {offsets = [0, 0], sizes = [64, 8], strides = [1, 1]} : vector<64x32xf32> to vector<64x8xf32>
    %16 = arith.truncf %15 : vector<64x8xf32> to vector<64x8xbf16>
    %17 = vector.extract_strided_slice %13 {offsets = [0, 0], sizes = [64, 8], strides = [1, 1]} : vector<64x32xf32> to vector<64x8xf32>
    %18 = arith.truncf %17 : vector<64x8xf32> to vector<64x8xbf16>
    %19 = vector.extract_strided_slice %14 {offsets = [0, 0], sizes = [64, 16], strides = [1, 1]} : vector<64x64xf32> to vector<64x16xf32>
    %20 = arith.truncf %19 : vector<64x16xf32> to vector<64x16xbf16>
    %cst_8 = arith.constant dense<0.000000e+00> : vector<64x64xf32>
    %21 = tpu.matmul %16, %18, %cst_8 {dimension_numbers = #tpu.dot_dimension_numbers<[1], [1], [0], [0], [0, 0, 1, 0], [], []>} : vector<64x8xbf16>, vector<64x8xbf16>, vector<64x64xf32> -> vector<64x64xf32>
    %cst_9 = arith.constant 0.353553385 : f32
    %22 = vector.broadcast %cst_9 : f32 to vector<64x64xf32>
    %23 = arith.mulf %21, %22 : vector<64x64xf32>
    %cst_10 = arith.constant dense<0xFF800000> : vector<64xf32>
    %24 = vector.multi_reduction <maximumf>, %23, %cst_10 [1] : vector<64x64xf32> to vector<64xf32>
    %25 = vector.shape_cast %24 : vector<64xf32> to vector<64x1xf32>
    %26 = vector.broadcast %25 : vector<64x1xf32> to vector<64x64xf32>
    %27 = arith.subf %23, %26 : vector<64x64xf32>
    %28 = math.exp %27 : vector<64x64xf32>
    %cst_11 = arith.constant dense<0.000000e+00> : vector<64xf32>
    %29 = vector.multi_reduction <add>, %28, %cst_11 [1] : vector<64x64xf32> to vector<64xf32>
    %30 = vector.shape_cast %29 : vector<64xf32> to vector<64x1xf32>
    %31 = tpu.reciprocal %30 {approx = true} : vector<64x1xf32> -> vector<64x1xf32>
    %32 = arith.truncf %28 : vector<64x64xf32> to vector<64x64xbf16>
    %cst_12 = arith.constant dense<0.000000e+00> : vector<64x16xf32>
    %33 = tpu.matmul %32, %20, %cst_12 {dimension_numbers = #tpu.dot_dimension_numbers<[1], [0], [0], [1], [0, 0, 1, 1], [], []>} : vector<64x64xbf16>, vector<64x16xbf16>, vector<64x16xf32> -> vector<64x16xf32>
    %34 = vector.broadcast %31 : vector<64x1xf32> to vector<64x16xf32>
    %35 = arith.mulf %33, %34 : vector<64x16xf32>
    %36 = vector.extract_strided_slice %12 {offsets = [0, 8], sizes = [64, 8], strides = [1, 1]} : vector<64x32xf32> to vector<64x8xf32>
    %37 = arith.truncf %36 : vector<64x8xf32> to vector<64x8xbf16>
    %38 = vector.extract_strided_slice %13 {offsets = [0, 8], sizes = [64, 8], strides = [1, 1]} : vector<64x32xf32> to vector<64x8xf32>
    %39 = arith.truncf %38 : vector<64x8xf32> to vector<64x8xbf16>
    %40 = vector.extract_strided_slice %14 {offsets = [0, 16], sizes = [64, 16], strides = [1, 1]} : vector<64x64xf32> to vector<64x16xf32>
    %41 = arith.truncf %40 : vector<64x16xf32> to vector<64x16xbf16>
    %cst_13 = arith.constant dense<0.000000e+00> : vector<64x64xf32>
    %42 = tpu.matmul %37, %39, %cst_13 {dimension_numbers = #tpu.dot_dimension_numbers<[1], [1], [0], [0], [0, 0, 1, 0], [], []>} : vector<64x8xbf16>, vector<64x8xbf16>, vector<64x64xf32> -> vector<64x64xf32>
    %cst_14 = arith.constant 0.353553385 : f32
    %43 = vector.broadcast %cst_14 : f32 to vector<64x64xf32>
    %44 = arith.mulf %42, %43 : vector<64x64xf32>
    %cst_15 = arith.constant dense<0xFF800000> : vector<64xf32>
    %45 = vector.multi_reduction <maximumf>, %44, %cst_15 [1] : vector<64x64xf32> to vector<64xf32>
    %46 = vector.shape_cast %45 : vector<64xf32> to vector<64x1xf32>
    %47 = vector.broadcast %46 : vector<64x1xf32> to vector<64x64xf32>
    %48 = arith.subf %44, %47 : vector<64x64xf32>
    %49 = math.exp %48 : vector<64x64xf32>
    %cst_16 = arith.constant dense<0.000000e+00> : vector<64xf32>
    %50 = vector.multi_reduction <add>, %49, %cst_16 [1] : vector<64x64xf32> to vector<64xf32>
    %51 = vector.shape_cast %50 : vector<64xf32> to vector<64x1xf32>
    %52 = tpu.reciprocal %51 {approx = true} : vector<64x1xf32> -> vector<64x1xf32>
    %53 = arith.truncf %49 : vector<64x64xf32> to vector<64x64xbf16>
    %cst_17 = arith.constant dense<0.000000e+00> : vector<64x16xf32>
    %54 = tpu.matmul %53, %41, %cst_17 {dimension_numbers = #tpu.dot_dimension_numbers<[1], [0], [0], [1], [0, 0, 1, 1], [], []>} : vector<64x64xbf16>, vector<64x16xbf16>, vector<64x16xf32> -> vector<64x16xf32>
    %55 = vector.broadcast %52 : vector<64x1xf32> to vector<64x16xf32>
    %56 = arith.mulf %54, %55 : vector<64x16xf32>
    %57 = vector.extract_strided_slice %12 {offsets = [0, 16], sizes = [64, 8], strides = [1, 1]} : vector<64x32xf32> to vector<64x8xf32>
    %58 = arith.truncf %57 : vector<64x8xf32> to vector<64x8xbf16>
    %59 = vector.extract_strided_slice %13 {offsets = [0, 16], sizes = [64, 8], strides = [1, 1]} : vector<64x32xf32> to vector<64x8xf32>
    %60 = arith.truncf %59 : vector<64x8xf32> to vector<64x8xbf16>
    %61 = vector.extract_strided_slice %14 {offsets = [0, 32], sizes = [64, 16], strides = [1, 1]} : vector<64x64xf32> to vector<64x16xf32>
    %62 = arith.truncf %61 : vector<64x16xf32> to vector<64x16xbf16>
    %cst_18 = arith.constant dense<0.000000e+00> : vector<64x64xf32>
    %63 = tpu.matmul %58, %60, %cst_18 {dimension_numbers = #tpu.dot_dimension_numbers<[1], [1], [0], [0], [0, 0, 1, 0], [], []>} : vector<64x8xbf16>, vector<64x8xbf16>, vector<64x64xf32> -> vector<64x64xf32>
    %cst_19 = arith.constant 0.353553385 : f32
    %64 = vector.broadcast %cst_19 : f32 to vector<64x64xf32>
    %65 = arith.mulf %63, %64 : vector<64x64xf32>
    %cst_20 = arith.constant dense<0xFF800000> : vector<64xf32>
    %66 = vector.multi_reduction <maximumf>, %65, %cst_20 [1] : vector<64x64xf32> to vector<64xf32>
    %67 = vector.shape_cast %66 : vector<64xf32> to vector<64x1xf32>
    %68 = vector.broadcast %67 : vector<64x1xf32> to vector<64x64xf32>
    %69 = arith.subf %65, %68 : vector<64x64xf32>
    %70 = math.exp %69 : vector<64x64xf32>
    %cst_21 = arith.constant dense<0.000000e+00> : vector<64xf32>
    %71 = vector.multi_reduction <add>, %70, %cst_21 [1] : vector<64x64xf32> to vector<64xf32>
    %72 = vector.shape_cast %71 : vector<64xf32> to vector<64x1xf32>
    %73 = tpu.reciprocal %72 {approx = true} : vector<64x1xf32> -> vector<64x1xf32>
    %74 = arith.truncf %70 : vector<64x64xf32> to vector<64x64xbf16>
    %cst_22 = arith.constant dense<0.000000e+00> : vector<64x16xf32>
    %75 = tpu.matmul %74, %62, %cst_22 {dimension_numbers = #tpu.dot_dimension_numbers<[1], [0], [0], [1], [0, 0, 1, 1], [], []>} : vector<64x64xbf16>, vector<64x16xbf16>, vector<64x16xf32> -> vector<64x16xf32>
    %76 = vector.broadcast %73 : vector<64x1xf32> to vector<64x16xf32>
    %77 = arith.mulf %75, %76 : vector<64x16xf32>
    %78 = vector.extract_strided_slice %12 {offsets = [0, 24], sizes = [64, 8], strides = [1, 1]} : vector<64x32xf32> to vector<64x8xf32>
    %79 = arith.truncf %78 : vector<64x8xf32> to vector<64x8xbf16>
    %80 = vector.extract_strided_slice %13 {offsets = [0, 24], sizes = [64, 8], strides = [1, 1]} : vector<64x32xf32> to vector<64x8xf32>
    %81 = arith.truncf %80 : vector<64x8xf32> to vector<64x8xbf16>
    %82 = vector.extract_strided_slice %14 {offsets = [0, 48], sizes = [64, 16], strides = [1, 1]} : vector<64x64xf32> to vector<64x16xf32>
    %83 = arith.truncf %82 : vector<64x16xf32> to vector<64x16xbf16>
    %cst_23 = arith.constant dense<0.000000e+00> : vector<64x64xf32>
    %84 = tpu.matmul %79, %81, %cst_23 {dimension_numbers = #tpu.dot_dimension_numbers<[1], [1], [0], [0], [0, 0, 1, 0], [], []>} : vector<64x8xbf16>, vector<64x8xbf16>, vector<64x64xf32> -> vector<64x64xf32>
    %cst_24 = arith.constant 0.353553385 : f32
    %85 = vector.broadcast %cst_24 : f32 to vector<64x64xf32>
    %86 = arith.mulf %84, %85 : vector<64x64xf32>
    %cst_25 = arith.constant dense<0xFF800000> : vector<64xf32>
    %87 = vector.multi_reduction <maximumf>, %86, %cst_25 [1] : vector<64x64xf32> to vector<64xf32>
    %88 = vector.shape_cast %87 : vector<64xf32> to vector<64x1xf32>
    %89 = vector.broadcast %88 : vector<64x1xf32> to vector<64x64xf32>
    %90 = arith.subf %86, %89 : vector<64x64xf32>
    %91 = math.exp %90 : vector<64x64xf32>
    %cst_26 = arith.constant dense<0.000000e+00> : vector<64xf32>
    %92 = vector.multi_reduction <add>, %91, %cst_26 [1] : vector<64x64xf32> to vector<64xf32>
    %93 = vector.shape_cast %92 : vector<64xf32> to vector<64x1xf32>
    %94 = tpu.reciprocal %93 {approx = true} : vector<64x1xf32> -> vector<64x1xf32>
    %95 = arith.truncf %91 : vector<64x64xf32> to vector<64x64xbf16>
    %cst_27 = arith.constant dense<0.000000e+00> : vector<64x16xf32>
    %96 = tpu.matmul %95, %83, %cst_27 {dimension_numbers = #tpu.dot_dimension_numbers<[1], [0], [0], [1], [0, 0, 1, 1], [], []>} : vector<64x64xbf16>, vector<64x16xbf16>, vector<64x16xf32> -> vector<64x16xf32>
    %97 = vector.broadcast %94 : vector<64x1xf32> to vector<64x16xf32>
    %98 = arith.mulf %96, %97 : vector<64x16xf32>
    %99 = tpu.concatenate %35, %56, %77, %98 in 1 : vector<64x16xf32>, vector<64x16xf32>, vector<64x16xf32>, vector<64x16xf32> -> vector<64x64xf32>
    %cst_28 = arith.constant 0.000000e+00 : f32
    %100 = vector.broadcast %cst_28 : f32 to vector<10x10x64xf32>
    %c0_29 = arith.constant 0 : index
    %c0_30 = arith.constant 0 : index
    %c0_31 = arith.constant 0 : index
    %101 = vector.load %arg12[%c0_29, %c0_30, %c0_31] : memref<10x10x64xf32, #tpu.memory_space<vmem>>, vector<10x10x64xf32>
    tpu.vector_store %arg12[%c0_29, %c0_30, %c0_31], %100 {strides = array<i32>} : memref<10x10x64xf32, #tpu.memory_space<vmem>>, vector<10x10x64xf32>,
    %102 = vector.shape_cast %14 : vector<64x64xf32> to vector<8x8x64xf32>
    %c1 = arith.constant 1 : index
    %c1_32 = arith.constant 1 : index
    %c0_33 = arith.constant 0 : index
    %103 = vector.load %arg12[%c1, %c1_32, %c0_33] : memref<10x10x64xf32, #tpu.memory_space<vmem>>, vector<8x8x64xf32>
    tpu.vector_store %arg12[%c1, %c1_32, %c0_33], %102 {strides = array<i32>} : memref<10x10x64xf32, #tpu.memory_space<vmem>>, vector<8x8x64xf32>,
    %c0_34 = arith.constant 0 : index
    %c0_35 = arith.constant 0 : index
    %c0_36 = arith.constant 0 : index
    %104 = vector.load %arg12[%c0_34, %c0_35, %c0_36] : memref<10x10x64xf32, #tpu.memory_space<vmem>>, vector<8x8x64xf32>
    %c0_37 = arith.constant 0 : index
    %c0_38 = arith.constant 0 : index
    %105 = vector.load %arg5[%c0_37, %c0_38] : memref<9x64xf32, #tpu.memory_space<vmem>>, vector<1x64xf32>
    %106 = vector.shape_cast %105 : vector<1x64xf32> to vector<1x1x64xf32>
    %107 = vector.broadcast %106 : vector<1x1x64xf32> to vector<8x8x64xf32>
    %108 = arith.mulf %104, %107 : vector<8x8x64xf32>
    %c0_39 = arith.constant 0 : index
    %c1_40 = arith.constant 1 : index
    %c0_41 = arith.constant 0 : index
    %109 = vector.load %arg12[%c0_39, %c1_40, %c0_41] : memref<10x10x64xf32, #tpu.memory_space<vmem>>, vector<8x8x64xf32>
    %c1_42 = arith.constant 1 : index
    %c0_43 = arith.constant 0 : index
    %110 = vector.load %arg5[%c1_42, %c0_43] : memref<9x64xf32, #tpu.memory_space<vmem>>, vector<1x64xf32>
    %111 = vector.shape_cast %110 : vector<1x64xf32> to vector<1x1x64xf32>
    %112 = vector.broadcast %111 : vector<1x1x64xf32> to vector<8x8x64xf32>
    %113 = arith.mulf %109, %112 : vector<8x8x64xf32>
    %114 = arith.addf %108, %113 : vector<8x8x64xf32>
    %c0_44 = arith.constant 0 : index
    %c2 = arith.constant 2 : index
    %c0_45 = arith.constant 0 : index
    %115 = vector.load %arg12[%c0_44, %c2, %c0_45] : memref<10x10x64xf32, #tpu.memory_space<vmem>>, vector<8x8x64xf32>
    %c2_46 = arith.constant 2 : index
    %c0_47 = arith.constant 0 : index
    %116 = vector.load %arg5[%c2_46, %c0_47] : memref<9x64xf32, #tpu.memory_space<vmem>>, vector<1x64xf32>
    %117 = vector.shape_cast %116 : vector<1x64xf32> to vector<1x1x64xf32>
    %118 = vector.broadcast %117 : vector<1x1x64xf32> to vector<8x8x64xf32>
    %119 = arith.mulf %115, %118 : vector<8x8x64xf32>
    %120 = arith.addf %114, %119 : vector<8x8x64xf32>
    %c1_48 = arith.constant 1 : index
    %c0_49 = arith.constant 0 : index
    %c0_50 = arith.constant 0 : index
    %121 = vector.load %arg12[%c1_48, %c0_49, %c0_50] : memref<10x10x64xf32, #tpu.memory_space<vmem>>, vector<8x8x64xf32>
    %c3 = arith.constant 3 : index
    %c0_51 = arith.constant 0 : index
    %122 = vector.load %arg5[%c3, %c0_51] : memref<9x64xf32, #tpu.memory_space<vmem>>, vector<1x64xf32>
    %123 = vector.shape_cast %122 : vector<1x64xf32> to vector<1x1x64xf32>
    %124 = vector.broadcast %123 : vector<1x1x64xf32> to vector<8x8x64xf32>
    %125 = arith.mulf %121, %124 : vector<8x8x64xf32>
    %126 = arith.addf %120, %125 : vector<8x8x64xf32>
    %c1_52 = arith.constant 1 : index
    %c1_53 = arith.constant 1 : index
    %c0_54 = arith.constant 0 : index
    %127 = vector.load %arg12[%c1_52, %c1_53, %c0_54] : memref<10x10x64xf32, #tpu.memory_space<vmem>>, vector<8x8x64xf32>
    %c4 = arith.constant 4 : index
    %c0_55 = arith.constant 0 : index
    %128 = vector.load %arg5[%c4, %c0_55] : memref<9x64xf32, #tpu.memory_space<vmem>>, vector<1x64xf32>
    %129 = vector.shape_cast %128 : vector<1x64xf32> to vector<1x1x64xf32>
    %130 = vector.broadcast %129 : vector<1x1x64xf32> to vector<8x8x64xf32>
    %131 = arith.mulf %127, %130 : vector<8x8x64xf32>
    %132 = arith.addf %126, %131 : vector<8x8x64xf32>
    %c1_56 = arith.constant 1 : index
    %c2_57 = arith.constant 2 : index
    %c0_58 = arith.constant 0 : index
    %133 = vector.load %arg12[%c1_56, %c2_57, %c0_58] : memref<10x10x64xf32, #tpu.memory_space<vmem>>, vector<8x8x64xf32>
    %c5 = arith.constant 5 : index
    %c0_59 = arith.constant 0 : index
    %134 = vector.load %arg5[%c5, %c0_59] : memref<9x64xf32, #tpu.memory_space<vmem>>, vector<1x64xf32>
    %135 = vector.shape_cast %134 : vector<1x64xf32> to vector<1x1x64xf32>
    %136 = vector.broadcast %135 : vector<1x1x64xf32> to vector<8x8x64xf32>
    %137 = arith.mulf %133, %136 : vector<8x8x64xf32>
    %138 = arith.addf %132, %137 : vector<8x8x64xf32>
    %c2_60 = arith.constant 2 : index
    %c0_61 = arith.constant 0 : index
    %c0_62 = arith.constant 0 : index
    %139 = vector.load %arg12[%c2_60, %c0_61, %c0_62] : memref<10x10x64xf32, #tpu.memory_space<vmem>>, vector<8x8x64xf32>
    %c6 = arith.constant 6 : index
    %c0_63 = arith.constant 0 : index
    %140 = vector.load %arg5[%c6, %c0_63] : memref<9x64xf32, #tpu.memory_space<vmem>>, vector<1x64xf32>
    %141 = vector.shape_cast %140 : vector<1x64xf32> to vector<1x1x64xf32>
    %142 = vector.broadcast %141 : vector<1x1x64xf32> to vector<8x8x64xf32>
    %143 = arith.mulf %139, %142 : vector<8x8x64xf32>
    %144 = arith.addf %138, %143 : vector<8x8x64xf32>
    %c2_64 = arith.constant 2 : index
    %c1_65 = arith.constant 1 : index
    %c0_66 = arith.constant 0 : index
    %145 = vector.load %arg12[%c2_64, %c1_65, %c0_66] : memref<10x10x64xf32, #tpu.memory_space<vmem>>, vector<8x8x64xf32>
    %c7 = arith.constant 7 : index
    %c0_67 = arith.constant 0 : index
    %146 = vector.load %arg5[%c7, %c0_67] : memref<9x64xf32, #tpu.memory_space<vmem>>, vector<1x64xf32>
    %147 = vector.shape_cast %146 : vector<1x64xf32> to vector<1x1x64xf32>
    %148 = vector.broadcast %147 : vector<1x1x64xf32> to vector<8x8x64xf32>
    %149 = arith.mulf %145, %148 : vector<8x8x64xf32>
    %150 = arith.addf %144, %149 : vector<8x8x64xf32>
    %c2_68 = arith.constant 2 : index
    %c2_69 = arith.constant 2 : index
    %c0_70 = arith.constant 0 : index
    %151 = vector.load %arg12[%c2_68, %c2_69, %c0_70] : memref<10x10x64xf32, #tpu.memory_space<vmem>>, vector<8x8x64xf32>
    %c8 = arith.constant 8 : index
    %c0_71 = arith.constant 0 : index
    %152 = vector.load %arg5[%c8, %c0_71] : memref<9x64xf32, #tpu.memory_space<vmem>>, vector<1x64xf32>
    %153 = vector.shape_cast %152 : vector<1x64xf32> to vector<1x1x64xf32>
    %154 = vector.broadcast %153 : vector<1x1x64xf32> to vector<8x8x64xf32>
    %155 = arith.mulf %151, %154 : vector<8x8x64xf32>
    %156 = arith.addf %150, %155 : vector<8x8x64xf32>
    %157 = vector.shape_cast %156 : vector<8x8x64xf32> to vector<64x64xf32>
    %c0_72 = arith.constant 0 : index
    %c0_73 = arith.constant 0 : index
    %158 = vector.load %arg6[%c0_72, %c0_73] : memref<1x64xf32, #tpu.memory_space<vmem>>, vector<1x64xf32>
    %159 = vector.broadcast %158 : vector<1x64xf32> to vector<64x64xf32>
    %160 = arith.mulf %157, %159 : vector<64x64xf32>
    %c0_74 = arith.constant 0 : index
    %c0_75 = arith.constant 0 : index
    %161 = vector.load %arg7[%c0_74, %c0_75] : memref<1x64xf32, #tpu.memory_space<vmem>>, vector<1x64xf32>
    %162 = vector.broadcast %161 : vector<1x64xf32> to vector<64x64xf32>
    %163 = arith.addf %160, %162 : vector<64x64xf32>
    %164 = arith.addf %99, %163 : vector<64x64xf32>
    %165 = arith.truncf %164 : vector<64x64xf32> to vector<64x64xbf16>
    %c0_76 = arith.constant 0 : index
    %c0_77 = arith.constant 0 : index
    %166 = vector.load %arg8[%c0_76, %c0_77] : memref<64x64xf32, #tpu.memory_space<vmem>>, vector<64x64xf32>
    %167 = arith.truncf %166 : vector<64x64xf32> to vector<64x64xbf16>
    %cst_78 = arith.constant dense<0.000000e+00> : vector<64x64xf32>
    %168 = tpu.matmul %165, %167, %cst_78 {dimension_numbers = #tpu.dot_dimension_numbers<[1], [0], [0], [1], [0, 0, 1, 1], [], []>} : vector<64x64xbf16>, vector<64x64xbf16>, vector<64x64xf32> -> vector<64x64xf32>
    %c0_79 = arith.constant 0 : index
    %c0_80 = arith.constant 0 : index
    %169 = vector.load %arg9[%c0_79, %c0_80] : memref<1x64xf32, #tpu.memory_space<vmem>>, vector<1x64xf32>
    %170 = vector.broadcast %169 : vector<1x64xf32> to vector<64x64xf32>
    %171 = arith.mulf %168, %170 : vector<64x64xf32>
    %c0_81 = arith.constant 0 : index
    %c0_82 = arith.constant 0 : index
    %172 = vector.load %arg10[%c0_81, %c0_82] : memref<1x64xf32, #tpu.memory_space<vmem>>, vector<1x64xf32>
    %173 = vector.broadcast %172 : vector<1x64xf32> to vector<64x64xf32>
    %174 = arith.addf %171, %173 : vector<64x64xf32>
    %c0_83 = arith.constant 0 : index
    %c0_84 = arith.constant 0 : index
    %c0_85 = arith.constant 0 : index
    %175 = vector.load %arg11[%c0_83, %c0_84, %c0_85] : memref<1x64x64xf32, #tpu.memory_space<vmem>>, vector<1x64x64xf32>
    %176 = vector.shape_cast %175 : vector<1x64x64xf32> to vector<64x64xf32>
    %177 = vector.shape_cast %174 : vector<64x64xf32> to vector<1x64x64xf32>
    tpu.vector_store %arg11[%c0_83, %c0_84, %c0_85], %177 {strides = array<i32>} : memref<1x64x64xf32, #tpu.memory_space<vmem>>, vector<1x64x64xf32>,
    return
  }
  func.func @transform_0(%arg0: i32) -> (i32, i32, i32) {
    %c0_i32 = arith.constant 0 : i32
    %c0_i32_0 = arith.constant 0 : i32
    %c0_i32_1 = arith.constant 0 : i32
    return %arg0, %c0_i32, %c0_i32_0 : i32, i32, i32
  }
  func.func @transform_1(%arg0: i32) -> (i32, i32) {
    %c0_i32 = arith.constant 0 : i32
    %c0_i32_0 = arith.constant 0 : i32
    %c0_i32_1 = arith.constant 0 : i32
    return %c0_i32, %c0_i32_0 : i32, i32
  }
  func.func @transform_2(%arg0: i32) -> (i32, i32) {
    %c0_i32 = arith.constant 0 : i32
    %c0_i32_0 = arith.constant 0 : i32
    %c0_i32_1 = arith.constant 0 : i32
    return %c0_i32, %c0_i32_0 : i32, i32
  }
  func.func @transform_3(%arg0: i32) -> (i32, i32) {
    %c0_i32 = arith.constant 0 : i32
    %c0_i32_0 = arith.constant 0 : i32
    %c0_i32_1 = arith.constant 0 : i32
    return %c0_i32, %c0_i32_0 : i32, i32
  }
  func.func @transform_4(%arg0: i32) -> (i32, i32) {
    %c0_i32 = arith.constant 0 : i32
    %c0_i32_0 = arith.constant 0 : i32
    %c0_i32_1 = arith.constant 0 : i32
    return %c0_i32, %c0_i32_0 : i32, i32
  }
  func.func @transform_5(%arg0: i32) -> (i32, i32) {
    %c0_i32 = arith.constant 0 : i32
    %c0_i32_0 = arith.constant 0 : i32
    %c0_i32_1 = arith.constant 0 : i32
    return %c0_i32, %c0_i32_0 : i32, i32
  }
  func.func @transform_6(%arg0: i32) -> (i32, i32) {
    %c0_i32 = arith.constant 0 : i32
    %c0_i32_0 = arith.constant 0 : i32
    %c0_i32_1 = arith.constant 0 : i32
    return %c0_i32, %c0_i32_0 : i32, i32
  }
  func.func @transform_7(%arg0: i32) -> (i32, i32) {
    %c0_i32 = arith.constant 0 : i32
    %c0_i32_0 = arith.constant 0 : i32
    %c0_i32_1 = arith.constant 0 : i32
    return %c0_i32, %c0_i32_0 : i32, i32
  }
  func.func @transform_8(%arg0: i32) -> (i32, i32) {
    %c0_i32 = arith.constant 0 : i32
    %c0_i32_0 = arith.constant 0 : i32
    %c0_i32_1 = arith.constant 0 : i32
    return %c0_i32, %c0_i32_0 : i32, i32
  }
  func.func @transform_9(%arg0: i32) -> (i32, i32) {
    %c0_i32 = arith.constant 0 : i32
    %c0_i32_0 = arith.constant 0 : i32
    %c0_i32_1 = arith.constant 0 : i32
    return %c0_i32, %c0_i32_0 : i32, i32
  }
  func.func @transform_10(%arg0: i32) -> (i32, i32, i32) {
    %c0_i32 = arith.constant 0 : i32
    %c0_i32_0 = arith.constant 0 : i32
    %c0_i32_1 = arith.constant 0 : i32
    return %arg0, %c0_i32, %c0_i32_0 : i32, i32, i32
  }
}

</mosaic_0001>

<bundles_post_ra>
// kernel: attention_forward.1
= control target key start
LH: loop header
LB: loop body
LE: loop exit
PB: predicated region body
PF: predicated region fallthrough
CT: control target
= control target key end

     0   :  { %15 = vsyncpa [#allocation4], 0  ;;  %s4037_s0 = inlined_call_operand.vmem [shape: f32[2,64,64], index: 0, kind: input, shape index: {}]   ;;  %s4038_s1 = inlined_call_operand.vmem [shape: f32[64,128], index: 1, kind: input, shape index: {}]   ;;  %s4039_s2 = inlined_call_operand.vmem [shape: f32[1,128], index: 2, kind: input, shape index: {}]   ;;  %s4040_s3 = inlined_call_operand.vmem [shape: f32[1,128], index: 3, kind: input, shape index: {}]   ;;  %s4041_s4 = inlined_call_operand.vmem [shape: f32[9,64], index: 4, kind: input, shape index: {}]   ;;  %s4042_s5 = inlined_call_operand.vmem [shape: f32[1,64], index: 5, kind: input, shape index: {}]   ;;  %s4043_s6 = inlined_call_operand.vmem [shape: f32[1,64], index: 6, kind: input, shape index: {}]   ;;  %s4044_s7 = inlined_call_operand.vmem [shape: f32[64,64], index: 7, kind: input, shape index: {}]   ;;  %s4045_s8 = inlined_call_operand.vmem [shape: f32[1,64], index: 8, kind: input, shape index: {}]   ;;  %s4046_s9 = inlined_call_operand.vmem [shape: f32[1,64], index: 9, kind: input, shape index: {}]   ;;  %s4047_s10 = inlined_call_operand.hbm [shape: f32[2,64,64], index: 10, kind: output, shape index: {}]  }
   0x1   :  { %17 = vsyncpa [#allocation4 + $0x1], 0  ;;  %s2992_s13 = smov 0   ;;  %s2994_s14 = smov 0  }
   0x2   :  { %s2996_s15 = smov 0   ;;  %s2998_s16 = smov 0  }
   0x3 LB: > { %s3013_s17 = sadd.s32 4294967295, %s2920_s16   ;;  %s2352_s18 = sadd.s32 4294967294, %s2920_s16   ;;  %s2920_s16 = sphi %s2998_s16, %s4077_s16   ;;  %s2916_s15 = sphi %s2996_s15, %s4076_s15   ;;  %s2912_s14 = sphi %s2994_s14, %s4075_s14   ;;  %s2908_s13 = sphi %s2992_s13, %s4074_s13  }
   0x4   : > { %s3017_s19 = sadd.s32 1, %s2920_s16   ;;  %s245_s20 = sadd.s32 1, %s2916_s15 }
   0x5   : > { %s242_s21 = ssub.s32 %s2920_s16, %s3017_s19  ;;  %p255_p0 = scmp.ne.s32.totalorder %s2916_s15, %s2912_s14 }
   0x6   : > { %p243_p1 = scmp.eq.s32.totalorder %s242_s21, 0  ;;  %p256_p2 = scmp.eq.s32.totalorder %s3013_s17, 1 }
   0x7   : > { %p261_p3 = scmp.ne.s32.totalorder %s2912_s14, %s2908_s13  ;;  %p262_p4 = scmp.eq.s32.totalorder %s2352_s18, 1 }
   0x8   : > { %s3028_s22 = scalar_select %p243_p1, %s2916_s15, %s245_s20  }
   0x9   : > { %p3030_p5 = por %p256_p2, %p255_p0  ;;  %p3034_p6 = por %p262_p4, %p261_p3 }
   0xa   : > { %p2355_p7 = scmp.ge.s32.totalorder %s2920_s16, 1  ;;  %p315_p8 = scmp.lt.s32.totalorder %s2920_s16, 3 }
   0xc   : > { %p316_p9 = pnand %p2355_p7, %p315_p8 }
   0xe   : > { %319 = sbr.rel (%p316_p9) target bundleno = 2701 (0xa8d), region = 60 }
  0x15   : > { %v371_v0 = vld [vmem:[%s4038_s1] sm:$0xff]  ;;  %v372_v1 = vld [vmem:[%s4038_s1 + $0x8] sm:$0xff]  ;;  %v373_v2 = vld [vmem:[%s4038_s1 + $0x10] sm:$0xff]  ;;  %p353_p10 = scmp.lt.s32.totalorder %s3013_s17, 1  ;;  %vm383_vm0 = vcmask 523264   ;;  %vm507_vm1 = vcmask 64512  }
  0x16   : > { %v379_v3 = vpack.c.bf16 %v372_v1, %v371_v0  ;;  %v374_v4 = vld [vmem:[%s4038_s1 + $0x18] sm:$0xff]  ;;  %v375_v6 = vld [vmem:[%s4038_s1 + $0x20] sm:$0xff]  ;;  %v376_v7 = vld [vmem:[%s4038_s1 + $0x28] sm:$0xff]  ;;  %s2922_s28 = smov 96   ;;  %s2923_s29 = smov 64   ;;  %vm1792_vm2 = vcmask 517120  }
  0x17   : > { %v380_v5 = vpack.c.bf16 %v374_v4, %v373_v2  ;;  %s354_s26 = scalar_select %p353_p10, %s3013_s17, 1  ;;  %v381_v8 = vpack.c.bf16 %v376_v7, %v375_v6  ;;  %v377_v9 = vld [vmem:[%s4038_s1 + $0x30] sm:$0xff]  ;;  %v378_v10 = vld [vmem:[%s4038_s1 + $0x38] sm:$0xff]  ;;  %v2363_v24 = vld [vmem:[%s4039_s2] ss:$0 sm:$0xff]  ;;  %vm1764_vm3 = vcmask 130048  }
  0x18   : > { %2501 = vmatprep.subr.bf16.mxu0 %v379_v3  ;;  %v382_v14 = vpack.c.bf16 %v378_v10, %v377_v9  ;;  %v2364_v29 = vld [vmem:[%s4040_s3] ss:$0 sm:$0xff]  ;;  %s2924_s30 = smov 88   ;;  %s2925_s11 = smov 120   ;;  %vm1773_vm4 = vcmask 261120   ;;  %vm1782_vm5 = vcmask 392192  }
  0x19   : > { %2502 = vmatpush3.bf16.msra.mxu0 %v379_v3  ;;  %s2419_s27 = sshll.u32 %s354_s26, 6  ;;  %s2927_s18 = smov 80  }
  0x1a   : > { %2503 = vmatprep.subr.bf16.mxu0 %v380_v5  ;;  %s357_s12 = scalar_lea.vmem %s4037_s0, %s2419_s27  ;;  %s2928_s20 = smov 112  }
  0x1b   : > { %v359_v11 = vld [vmem:[%s357_s12] sm:$0xff]  ;;  %v360_v12 = vld [vmem:[%s357_s12 + $0x8] sm:$0xff]  ;;  %v361_v15 = vld [vmem:[%s357_s12 + $0x10] sm:$0xff]  ;;  %s2929_s21 = smov 32   ;;  %s2930_s25 = smov 72  }
  0x1c   : > { %v367_v13 = vpack.c.bf16 %v360_v12, %v359_v11  ;;  %v362_v16 = vld [vmem:[%s357_s12 + $0x18] sm:$0xff]  ;;  %v363_v17 = vld [vmem:[%s357_s12 + $0x20] sm:$0xff]  ;;  %v364_v18 = vld [vmem:[%s357_s12 + $0x28] sm:$0xff]  ;;  %s2931_s26 = smov 104   ;;  %s2932_s27 = smov 16  }
  0x1d   : > { %2504 = vmatpush3.bf16.msra.mxu0 %v380_v5  ;;  %v368_v19 = vpack.c.bf16 %v362_v16, %v361_v15  ;;  %v369_v20 = vpack.c.bf16 %v364_v18, %v363_v17  ;;  %v365_v21 = vld [vmem:[%s357_s12 + $0x30] sm:$0xff]  ;;  %v366_v22 = vld [vmem:[%s357_s12 + $0x38] sm:$0xff]  ;;  %s2926_s12 = smov 48  }
  0x1e   : > { %2505 = vmatprep.subr.bf16.mxu0 %v381_v8  ;;  %2509 = vmatprep.mubr.msk.bf16.mxu0 %vm383_vm0, %v367_v13  ;;  %v370_v23 = vpack.c.bf16 %v366_v22, %v365_v21 }
  0x21   : > { %2506 = vmatpush3.bf16.msra.mxu0 %v381_v8 }
  0x22   : > { %2507 = vmatprep.subr.bf16.mxu0 %v382_v14 }
  0x25   : > { %2508 = vmatpush3.bf16.msra.mxu0 %v382_v14 }
  0x28   : > { %2510 = vmatmul.mubr.msk.bf16.vlgmr.msra.gmra.mrb[0].mxu0 %vm383_vm0, %v368_v19 }
  0x29   : > { %2513 = vmatprep.mubr.msk.bf16.mxu0 %vm383_vm0, %v369_v20 }
  0x30   : > { %2514 = vmatmul.mubr.msk.bf16.gmra.mrb[4].mxu0 %vm383_vm0, %v370_v23 }
  0xfb   : > { %v2511_v25 = vpop.f32.mrb[0].mxu0 }
  0xfc   : > { %v430_v26 = vpop.f32.mrb[1].mxu0  ;;  %v470_v33 = vmul.f32 %v2511_v25, %v2363_v24 }
  0xfd   : > { %v468_v27 = vmul.f32 %v2363_v24, %v430_v26  ;;  %v2512_v28 = vpop.f32.mrb[2].mxu0 }
  0xfe   : > { %v433_v30 = vpop.f32.mrb[3].mxu0  ;;  %v471_v31 = vmul.f32 %v2512_v28, %v2363_v24  ;;  %v3089_v40 = vadd.f32 %v2364_v29, %v470_v33 }
  0xff   : > { %v469_v32 = vmul.f32 %v2363_v24, %v433_v30  ;;  %v3079_v34 = vadd.f32 %v2364_v29, %v468_v27 }
 0x100   : > { %v3083_v36 = vadd.f32 %v2364_v29, %v471_v31 }
 0x101   : > { %v3081_v35 = vadd.f32 %v2364_v29, %v469_v32 }
 0x102   : > { %v3096_v46 = vpack.c.bf16 %v3083_v36, %v3089_v40 }
 0x103   : > { %v3087_v37 = vpack.c.bf16 %v3081_v35, %v3079_v34  ;;  %v2515_v38 = vpop.f32.mrb[4].mxu0 }
 0x104   : > { %v446_v39 = vpop.f32.mrb[5].mxu0  ;;  %v474_v41 = vmul.f32 %v2515_v38, %v2363_v24 }
 0x105   : > { %v472_v42 = vmul.f32 %v2363_v24, %v446_v39  ;;  %499 = vrot.lane.b32.xlu0 %v3087_v37, %s2922_s28  ;;  %v2516_v43 = vpop.f32.mrb[6].mxu0  ;;  %2525 = vmatprep.mubr.msk.bf16.mxu1 %vm507_vm1, %v3087_v37 }
 0x106   : > { %v475_v44 = vmul.f32 %v2516_v43, %v2363_v24  ;;  %v449_v45 = vpop.f32.mrb[7].mxu0  ;;  %v3100_v49 = vadd.f32 %v2364_v29, %v474_v41 }
 0x107   : > { %v3098_v47 = vadd.f32 %v2364_v29, %v472_v42  ;;  %v473_v48 = vmul.f32 %v2363_v24, %v449_v45 }
 0x108   : > { %v3102_v50 = vadd.f32 %v2364_v29, %v475_v44 }
 0x109   : > { %v3104_v51 = vadd.f32 %v2364_v29, %v473_v48  ;;  %501 = vrot.lane.b32.xlu0 %v3096_v46, %s2922_s28 }
 0x10a   : > { %v3113_v53 = vpack.c.bf16 %v3102_v50, %v3100_v49 }
 0x10b   : > { %v3109_v52 = vpack.c.bf16 %v3104_v51, %v3098_v47 }
 0x10d   : > { %691 = vrot.lane.b32.xlu0 %v3096_v46, %s2923_s29  ;;  %503 = vrot.lane.b32.xlu1 %v3109_v52, %s2922_s28 }
 0x111   : > { %505 = vrot.lane.b32.xlu1 %v3113_v53, %s2922_s28 }
 0x115   : > { %689 = vrot.lane.b32.xlu1 %v3087_v37, %s2923_s29 }
 0x119   : > { %695 = vrot.lane.b32.xlu1 %v3113_v53, %s2923_s29 }
 0x11d   : > { %794 = vrot.lane.b32.xlu1 %v3087_v37, %s2924_s30 }
 0x121   : > { %693 = vrot.lane.b32.xlu1 %v3109_v52, %s2923_s29 }
 0x177   : > { %v500_v54 = vpop.permute.xlu0 %499 }
 0x178   : > { %2661 = vmatprep.subr.msk.bf16.mxu1 %vm507_vm1, %v500_v54  ;;  %v521_v55 = vsel %vm507_vm1, %v500_v54, 0 }
 0x179   : > { %2518 = vmatpush3.bf16.xpose.msra.mxu1 %v521_v55 }
 0x17b   : > { %v502_v56 = vpop.permute.xlu0 %501 }
 0x17c   : > { %2662 = vmatprep.subr.msk.bf16.mxu1 %vm507_vm1, %v502_v56  ;;  %v524_v58 = vsel %vm507_vm1, %v502_v56, 0 }
 0x17f   : > { %v504_v57 = vpop.permute.xlu1 %503  ;;  %v692_v62 = vpop.permute.xlu0 %691 }
 0x180   : > { %v527_v61 = vsel %vm507_vm1, %v504_v57, 0 }
 0x181   : > { %2520 = vmatpush3.bf16.xpose.msra.mxu1 %v524_v58 }
 0x182   : > { %2663 = vmatprep.subr.msk.bf16.mxu1 %vm507_vm1, %v504_v57 }
 0x183   : > { %v506_v59 = vpop.permute.xlu1 %505 }
 0x184   : > { %v530_v1 = vsel %vm507_vm1, %v506_v59, 0 }
 0x187   : > { %v690_v60 = vpop.permute.xlu1 %689 }
 0x188   : > { %2533 = vmatprep.subr.bf16.mxu0 %v690_v60 }
 0x189   : > { %2522 = vmatpush3.bf16.xpose.msra.mxu1 %v527_v61  ;;  %2534 = vmatpush3.bf16.msra.mxu0 %v690_v60 }
 0x18a   : > { %2664 = vmatprep.subr.msk.bf16.mxu1 %vm507_vm1, %v506_v59  ;;  %2535 = vmatprep.subr.bf16.mxu0 %v692_v62 }
 0x18b   : > { %v696_v63 = vpop.permute.xlu1 %695 }
 0x18d   : > { %2536 = vmatpush3.bf16.msra.mxu0 %v692_v62 }
 0x18f   : > { %v3134_v0 = vpop.permute.xlu1 %794 }
 0x190   : > { %v815_v60 = vsel %vm507_vm1, %v3134_v0, 0 }
 0x191   : > { %2524 = vmatpush3.bf16.xpose.msra.mxu1 %v530_v1 }
 0x193   : > { %v694_v2 = vpop.permute.xlu1 %693 }
 0x194   : > { %2537 = vmatprep.subr.bf16.mxu0 %v694_v2 }
 0x195   : > { %2538 = vmatpush3.bf16.msra.mxu0 %v694_v2 }
 0x196   : > { %2539 = vmatprep.subr.bf16.mxu0 %v696_v63 }
 0x198   : > { %2526 = vmatmul.mubr.msk.bf16.vlgmr.msra.gmra.mrb[0].mxu1 %vm507_vm1, %v3096_v46 }
 0x199   : > { %2529 = vmatprep.mubr.msk.bf16.mxu1 %vm507_vm1, %v3109_v52  ;;  %2540 = vmatpush3.bf16.msra.mxu0 %v696_v63 }
 0x19a   : > { %2665 = vmatprep.subr.msk.bf16.mxu0 %vm507_vm1, %v3134_v0 }
 0x1a0   : > { %2530 = vmatmul.mubr.msk.bf16.gmra.mrb[4].mxu1 %vm507_vm1, %v3113_v53 }
 0x26b   : > { %v2527_v3 = vpop.f32.mrb[0].mxu1 }
 0x26c   : > { %v599_v4 = vmul.f32 0.35355338, %v2527_v3  ;;  %v566_v5 = vpop.f32.mrb[1].mxu1 }
 0x26d   : > { %v2528_v6 = vpop.f32.mrb[2].mxu1  ;;  %v597_v7 = vmul.f32 0.35355338, %v566_v5 }
 0x26e   : > { %v569_v8 = vpop.f32.mrb[3].mxu1  ;;  %v611_v9 = vsel %vm383_vm0, %v599_v4, -inf  ;;  %v600_v12 = vmul.f32 0.35355338, %v2528_v6 }
 0x26f   : > { %v598_v10 = vmul.f32 0.35355338, %v569_v8  ;;  %612 = vmax.xlane.f32.xlu0 %v611_v9  ;;  %v605_v13 = vsel %vm383_vm0, %v597_v7, -inf }
 0x270   : > { %v614_v19 = vsel %vm383_vm0, %v600_v12, -inf }
 0x271   : > { %v608_v11 = vsel %vm383_vm0, %v598_v10, -inf }
 0x272   : > { %609 = vmax.xlane.f32.xlu1 %v608_v11 }
 0x273   : > { %606 = vmax.xlane.f32.xlu0 %v605_v13  ;;  %v2531_v14 = vpop.f32.mrb[4].mxu1 }
 0x274   : > { %v582_v15 = vpop.f32.mrb[5].mxu1  ;;  %v3148_v17 = vmul.f32 0.35355338, %v2531_v14 }
 0x275   : > { %v2532_v16 = vpop.f32.mrb[6].mxu1  ;;  %v3151_v20 = vmul.f32 0.35355338, %v582_v15 }
 0x276   : > { %v585_v18 = vpop.f32.mrb[7].mxu1  ;;  %v623_v21 = vsel %vm383_vm0, %v3148_v17, -inf  ;;  %v3155_v22 = vmul.f32 0.35355338, %v2532_v16 }
 0x277   : > { %615 = vmax.xlane.f32.xlu0 %v614_v19  ;;  %v617_v23 = vsel %vm383_vm0, %v3151_v20, -inf  ;;  %v602_v25 = vmul.f32 0.35355338, %v585_v18 }
 0x278   : > { %v626_v24 = vsel %vm383_vm0, %v3155_v22, -inf }
 0x279   : > { %v620_v26 = vsel %vm383_vm0, %v602_v25, -inf }
 0x27b   : > { %624 = vmax.xlane.f32.xlu0 %v623_v21 }
 0x27f   : > { %618 = vmax.xlane.f32.xlu0 %v617_v23 }
 0x283   : > { %798 = vrot.lane.b32.xlu1 %v3109_v52, %s2924_s30  ;;  %627 = vmax.xlane.f32.xlu0 %v626_v24 }
 0x299   : > { %796 = vrot.lane.b32.xlu0 %v3096_v46, %s2924_s30 }
 0x29d   : > { %786 = vrot.lane.b32.xlu0 %v3087_v37, %s2925_s11 }
 0x2a1   : > { %790 = vrot.lane.b32.xlu0 %v3109_v52, %s2925_s11 }
 0x2a5   : > { %985 = vrot.lane.b32.xlu0 %v3096_v46, %s2926_s12 }
 0x2a7   : > { %621 = vmax.xlane.f32.xlu1 %v620_v26 }
 0x2b8   : > { %800 = vrot.lane.b32.xlu1 %v3113_v53, %s2924_s30 }
 0x2bc   : > { %788 = vrot.lane.b32.xlu1 %v3096_v46, %s2925_s11 }
 0x2c0   : > { %792 = vrot.lane.b32.xlu1 %v3113_v53, %s2925_s11  ;;  %s2420_s11 = sshll.u32 %s3013_s17, 10 }
 0x2c4   : > { %983 = vrot.lane.b32.xlu1 %v3087_v37, %s2926_s12 }
 0x2c8   : > { %987 = vrot.lane.b32.xlu1 %v3109_v52, %s2926_s12 }
 0x2cc   : > { %989 = vrot.lane.b32.xlu1 %v3113_v53, %s2926_s12 }
 0x2d0   : > { %1088 = vrot.lane.b32.xlu1 %v3087_v37, %s2927_s18 }
 0x2fc   : > { %v613_v27 = vpop.xlane.xlu0 %612 }
 0x2fd   : > { %v631_v29 = vsub.f32 %v599_v4, %v613_v27 }
 0x2ff   : > { %v610_v28 = vpop.xlane.xlu1 %609  ;;  %v641_v39 = vmul.f32 1.442695, %v631_v29 }
 0x300   : > { %v630_v30 = vsub.f32 %v598_v10, %v610_v28  ;;  %v607_v31 = vpop.xlane.xlu0 %606 }
 0x301   : > { %v629_v32 = vsub.f32 %v597_v7, %v607_v31 }
 0x302   : > { %v639_v33 = vmul.f32 1.442695, %v630_v30 }
 0x303   : > { %v637_v38 = vmul.f32 1.442695, %v629_v32  ;;  %v799_v63 = vpop.permute.xlu1 %798 }
 0x304   : > { %2730 = vpow2.f32 %v639_v33  ;;  %v616_v41 = vpop.xlane.xlu0 %615  ;;  %v821_v1 = vsel %vm507_vm1, %v799_v63, 0 }
 0x305   : > { %2732 = vpow2.f32 %v637_v38  ;;  %v632_v42 = vsub.f32 %v600_v12, %v616_v41 }
 0x306   : > { %2734 = vpow2.f32 %v641_v39 }
 0x307   : > { %v643_v43 = vmul.f32 1.442695, %v632_v42 }
 0x308   : > { %v625_v44 = vpop.xlane.xlu0 %624 }
 0x309   : > { %2736 = vpow2.f32 %v643_v43  ;;  %v635_v4 = vsub.f32 %v3148_v17, %v625_v44 }
 0x30b   : > { %v649_v8 = vmul.f32 1.442695, %v635_v4 }
 0x30c   : > { %v619_v45 = vpop.xlane.xlu0 %618 }
 0x30d   : > { %v633_v2 = vsub.f32 %v3151_v20, %v619_v45 }
 0x30e   : > { %v3182_v48 = vpop.eup %2730 }
 0x30f   : > { %v3184_v54 = vpop.eup %2732  ;;  %v645_v0 = vmul.f32 1.442695, %v633_v2 }
 0x310   : > { %v685_v55 = vpack.c.bf16 %v3182_v48, %v3184_v54  ;;  %v628_v56 = vpop.xlane.xlu0 %627  ;;  %v3188_v57 = vpop.eup %2734 }
 0x311   : > { %v636_v3 = vsub.f32 %v3155_v22, %v628_v56  ;;  %2738 = vpow2.f32 %v645_v0 }
 0x312   : > { %2541 = vmatprep.mubr.msk.bf16.mxu0 %vm383_vm0, %v685_v55 }
 0x313   : > { %v3191_v58 = vpop.eup %2736  ;;  %v651_v5 = vmul.f32 1.442695, %v636_v3 }
 0x314   : > { %v686_v59 = vpack.c.bf16 %v3191_v58, %v3188_v57  ;;  %v797_v61 = vpop.permute.xlu0 %796 }
 0x315   : > { %v818_v62 = vsel %vm507_vm1, %v797_v61, 0  ;;  %2740 = vpow2.f32 %v651_v5 }
 0x316   : > { %2542 = vmatmul.mubr.msk.bf16.vlgmr.msra.gmra.mrb[8].mxu0 %vm383_vm0, %v686_v59 }
 0x317   : > { %2550 = vmatpush3.bf16.xpose.msra.mxu0 %v815_v60 }
 0x318   : > { %2666 = vmatprep.subr.msk.bf16.mxu0 %vm507_vm1, %v797_v61  ;;  %v787_v12 = vpop.permute.xlu0 %786 }
 0x31b   : > { %v3207_v16 = vpop.eup %2738 }
 0x31c   : > { %v791_v14 = vpop.permute.xlu0 %790 }
 0x31f   : > { %2552 = vmatpush3.bf16.xpose.msra.mxu0 %v818_v62  ;;  %v3209_v17 = vpop.eup %2740 }
 0x320   : > { %2667 = vmatprep.subr.msk.bf16.mxu0 %vm507_vm1, %v799_v63  ;;  %v986_v23 = vpop.permute.xlu0 %985 }
 0x327   : > { %2554 = vmatpush3.bf16.xpose.msra.mxu0 %v821_v1 }
 0x334   : > { %v622_v6 = vpop.xlane.xlu1 %621 }
 0x335   : > { %v634_v7 = vsub.f32 %v602_v25, %v622_v6 }
 0x337   : > { %v647_v9 = vmul.f32 1.442695, %v634_v7 }
 0x338   : > { %v801_v10 = vpop.permute.xlu1 %800 }
 0x339   : > { %2742 = vpow2.f32 %v647_v9  ;;  %2668 = vmatprep.subr.msk.bf16.mxu0 %vm507_vm1, %v801_v10  ;;  %v824_v11 = vsel %vm507_vm1, %v801_v10, 0 }
 0x33a   : > { %2744 = vpow2.f32 %v649_v8  ;;  %2556 = vmatpush3.bf16.xpose.msra.mxu0 %v824_v11 }
 0x33c   : > { %v789_v13 = vpop.permute.xlu1 %788 }
 0x340   : > { %v793_v15 = vpop.permute.xlu1 %792 }
 0x343   : > { %v3211_v18 = vpop.eup %2742 }
 0x344   : > { %v3213_v19 = vpop.eup %2744  ;;  %v984_v20 = vpop.permute.xlu1 %983  ;;  %v687_v21 = vpack.c.bf16 %v3211_v18, %v3207_v16 }
 0x345   : > { %2565 = vmatprep.subr.bf16.mxu1 %v984_v20  ;;  %v688_v22 = vpack.c.bf16 %v3209_v17, %v3213_v19 }
 0x346   : > { %2545 = vmatprep.mubr.msk.bf16.mxu0 %vm383_vm0, %v687_v21  ;;  %2566 = vmatpush3.bf16.msra.mxu1 %v984_v20 }
 0x347   : > { %2546 = vmatmul.mubr.msk.bf16.gmra.mrb[12].mxu0 %vm383_vm0, %v688_v22  ;;  %2567 = vmatprep.subr.bf16.mxu1 %v986_v23 }
 0x348   : > { %2557 = vmatprep.mubr.msk.bf16.mxu0 %vm507_vm1, %v787_v12  ;;  %v988_v24 = vpop.permute.xlu1 %987 }
 0x34a   : > { %2568 = vmatpush3.bf16.msra.mxu1 %v986_v23 }
 0x34b   : > { %2569 = vmatprep.subr.bf16.mxu1 %v988_v24 }
 0x34c   : > { %v990_v25 = vpop.permute.xlu1 %989 }
 0x34e   : > { %2570 = vmatpush3.bf16.msra.mxu1 %v988_v24 }
 0x34f   : > { %2558 = vmatmul.mubr.msk.bf16.vlgmr.msra.gmra.mrb[16].mxu0 %vm507_vm1, %v789_v13  ;;  %2571 = vmatprep.subr.bf16.mxu1 %v990_v25 }
 0x350   : > { %2561 = vmatprep.mubr.msk.bf16.mxu0 %vm507_vm1, %v791_v14  ;;  %v3224_v26 = vpop.permute.xlu1 %1088 }
 0x352   : > { %2572 = vmatpush3.bf16.msra.mxu1 %v990_v25 }
 0x353   : > { %2669 = vmatprep.subr.msk.bf16.mxu1 %vm507_vm1, %v3224_v26 }
 0x357   : > { %2562 = vmatmul.mubr.msk.bf16.gmra.mrb[20].mxu0 %vm507_vm1, %v793_v15 }
 0x3e9   : > { %v3229_v27 = vpop.f32.mrb[8].mxu0 }
 0x3ea   : > { %4050 = vst [vmem:[#allocation6_spill] sm:$0xff] %v3229_v27  ;;  %v3231_v28 = vpop.f32.mrb[9].mxu0 }
 0x3eb   : > { %4051 = vst [vmem:[#allocation7_spill] sm:$0xff] %v3231_v28  ;;  %v3233_v29 = vpop.f32.mrb[10].mxu0 }
 0x3ec   : > { %4052 = vst [vmem:[#allocation8_spill] sm:$0xff] %v3233_v29  ;;  %v3235_v30 = vpop.f32.mrb[11].mxu0 }
 0x3ed   : > { %4053 = vst [vmem:[#allocation9_spill] sm:$0xff] %v3235_v30 }
 0x41a   : > { %v3237_v31 = vpop.f32.mrb[12].mxu0 }
 0x41b   : > { %4054 = vst [vmem:[#allocation10_spill] sm:$0xff] %v3237_v31  ;;  %v3239_v32 = vpop.f32.mrb[13].mxu0 }
 0x41c   : > { %4055 = vst [vmem:[#allocation11_spill] sm:$0xff] %v3239_v32  ;;  %v3241_v33 = vpop.f32.mrb[14].mxu0 }
 0x41d   : > { %4056 = vst [vmem:[#allocation12_spill] sm:$0xff] %v3241_v33  ;;  %v3243_v38 = vpop.f32.mrb[15].mxu0 }
 0x41e   : > { %4057 = vst [vmem:[#allocation13_spill] sm:$0xff] %v3243_v38 }
 0x422   : > { %v2559_v39 = vpop.f32.mrb[16].mxu0 }
 0x423   : > { %v893_v41 = vmul.f32 0.35355338, %v2559_v39  ;;  %v860_v42 = vpop.f32.mrb[17].mxu0 }
 0x424   : > { %v2560_v43 = vpop.f32.mrb[18].mxu0  ;;  %v891_v44 = vmul.f32 0.35355338, %v860_v42 }
 0x425   : > { %v863_v45 = vpop.f32.mrb[19].mxu0  ;;  %v905_v55 = vsel %vm383_vm0, %v893_v41, -inf  ;;  %v894_v60 = vmul.f32 0.35355338, %v2560_v43 }
 0x426   : > { %v892_v56 = vmul.f32 0.35355338, %v863_v45  ;;  %906 = vmax.xlane.f32.xlu0 %v905_v55  ;;  %v899_v61 = vsel %vm383_vm0, %v891_v44, -inf }
 0x427   : > { %v908_v4 = vsel %vm383_vm0, %v894_v60, -inf }
 0x428   : > { %v902_v59 = vsel %vm383_vm0, %v892_v56, -inf }
 0x429   : > { %903 = vmax.xlane.f32.xlu1 %v902_v59 }
 0x42a   : > { %900 = vmax.xlane.f32.xlu0 %v899_v61  ;;  %v2563_v62 = vpop.f32.mrb[20].mxu0  ;;  %v1109_v61 = vsel %vm507_vm1, %v3224_v26, 0 }
 0x42b   : > { %v876_v63 = vpop.f32.mrb[21].mxu0  ;;  %v3248_v2 = vmul.f32 0.35355338, %v2563_v62 }
 0x42c   : > { %v2564_v1 = vpop.f32.mrb[22].mxu0  ;;  %v3251_v0 = vmul.f32 0.35355338, %v876_v63 }
 0x42d   : > { %v879_v3 = vpop.f32.mrb[23].mxu0  ;;  %v917_v5 = vsel %vm383_vm0, %v3248_v2, -inf  ;;  %v3255_v6 = vmul.f32 0.35355338, %v2564_v1 }
 0x42e   : > { %909 = vmax.xlane.f32.xlu0 %v908_v4  ;;  %v911_v7 = vsel %vm383_vm0, %v3251_v0, -inf  ;;  %v896_v9 = vmul.f32 0.35355338, %v879_v3 }
 0x42f   : > { %v920_v8 = vsel %vm383_vm0, %v3255_v6, -inf }
 0x430   : > { %v914_v10 = vsel %vm383_vm0, %v896_v9, -inf }
 0x432   : > { %918 = vmax.xlane.f32.xlu0 %v917_v5 }
 0x436   : > { %912 = vmax.xlane.f32.xlu0 %v911_v7 }
 0x43a   : > { %1092 = vrot.lane.b32.xlu1 %v3109_v52, %s2927_s18  ;;  %921 = vmax.xlane.f32.xlu0 %v920_v8 }
 0x450   : > { %1090 = vrot.lane.b32.xlu0 %v3096_v46, %s2927_s18 }
 0x454   : > { %1080 = vrot.lane.b32.xlu0 %v3087_v37, %s2928_s20 }
 0x458   : > { %1084 = vrot.lane.b32.xlu0 %v3109_v52, %s2928_s20 }
 0x45c   : > { %1279 = vrot.lane.b32.xlu0 %v3096_v46, %s2929_s21 }
 0x45e   : > { %915 = vmax.xlane.f32.xlu1 %v914_v10 }
 0x46f   : > { %1094 = vrot.lane.b32.xlu1 %v3113_v53, %s2927_s18 }
 0x473   : > { %1082 = vrot.lane.b32.xlu1 %v3096_v46, %s2928_s20 }
 0x477   : > { %1086 = vrot.lane.b32.xlu1 %v3113_v53, %s2928_s20 }
 0x47b   : > { %1277 = vrot.lane.b32.xlu1 %v3087_v37, %s2929_s21 }
 0x47f   : > { %1281 = vrot.lane.b32.xlu1 %v3109_v52, %s2929_s21 }
 0x483   : > { %1283 = vrot.lane.b32.xlu1 %v3113_v53, %s2929_s21 }
 0x487   : > { %1382 = vrot.lane.b32.xlu1 %v3087_v37, %s2930_s25 }
 0x4b3   : > { %v907_v11 = vpop.xlane.xlu0 %906 }
 0x4b4   : > { %v925_v13 = vsub.f32 %v893_v41, %v907_v11 }
 0x4b6   : > { %v904_v12 = vpop.xlane.xlu1 %903  ;;  %v935_v23 = vmul.f32 1.442695, %v925_v13 }
 0x4b7   : > { %v924_v14 = vsub.f32 %v892_v56, %v904_v12  ;;  %v901_v15 = vpop.xlane.xlu0 %900 }
 0x4b8   : > { %v923_v20 = vsub.f32 %v891_v44, %v901_v15 }
 0x4b9   : > { %v933_v21 = vmul.f32 1.442695, %v924_v14 }
 0x4ba   : > { %v931_v22 = vmul.f32 1.442695, %v923_v20  ;;  %v1093_v1 = vpop.permute.xlu1 %1092 }
 0x4bb   : > { %2746 = vpow2.f32 %v933_v21  ;;  %v910_v24 = vpop.xlane.xlu0 %909  ;;  %v1115_v3 = vsel %vm507_vm1, %v1093_v1, 0 }
 0x4bc   : > { %2748 = vpow2.f32 %v931_v22  ;;  %v926_v25 = vsub.f32 %v894_v60, %v910_v24 }
 0x4bd   : > { %2750 = vpow2.f32 %v935_v23 }
 0x4be   : > { %v937_v39 = vmul.f32 1.442695, %v926_v25 }
 0x4bf   : > { %v919_v42 = vpop.xlane.xlu0 %918 }
 0x4c0   : > { %2752 = vpow2.f32 %v937_v39  ;;  %v929_v7 = vsub.f32 %v3248_v2, %v919_v42 }
 0x4c2   : > { %v943_v12 = vmul.f32 1.442695, %v929_v7 }
 0x4c3   : > { %v913_v43 = vpop.xlane.xlu0 %912 }
 0x4c4   : > { %v927_v4 = vsub.f32 %v3251_v0, %v913_v43 }
 0x4c5   : > { %v3282_v45 = vpop.eup %2746 }
 0x4c6   : > { %v3284_v55 = vpop.eup %2748  ;;  %v939_v26 = vmul.f32 1.442695, %v927_v4 }
 0x4c7   : > { %v979_v41 = vpack.c.bf16 %v3282_v45, %v3284_v55  ;;  %v922_v44 = vpop.xlane.xlu0 %921  ;;  %v3288_v56 = vpop.eup %2750 }
 0x4c8   : > { %v930_v5 = vsub.f32 %v3255_v6, %v922_v44  ;;  %2754 = vpow2.f32 %v939_v26 }
 0x4c9   : > { %2573 = vmatprep.mubr.msk.bf16.mxu1 %vm383_vm0, %v979_v41 }
 0x4ca   : > { %v3291_v59 = vpop.eup %2752  ;;  %v945_v8 = vmul.f32 1.442695, %v930_v5 }
 0x4cb   : > { %v980_v60 = vpack.c.bf16 %v3291_v59, %v3288_v56  ;;  %v1091_v62 = vpop.permute.xlu0 %1090 }
 0x4cc   : > { %v1112_v63 = vsel %vm507_vm1, %v1091_v62, 0  ;;  %2756 = vpow2.f32 %v945_v8 }
 0x4cd   : > { %2574 = vmatmul.mubr.msk.bf16.vlgmr.msra.gmra.mrb[8].mxu1 %vm383_vm0, %v980_v60 }
 0x4ce   : > { %2582 = vmatpush3.bf16.xpose.msra.mxu1 %v1109_v61 }
 0x4cf   : > { %2670 = vmatprep.subr.msk.bf16.mxu1 %vm507_vm1, %v1091_v62  ;;  %v1081_v0 = vpop.permute.xlu0 %1080 }
 0x4d2   : > { %v3307_v21 = vpop.eup %2754 }
 0x4d3   : > { %v1085_v20 = vpop.permute.xlu0 %1084 }
 0x4d6   : > { %2584 = vmatpush3.bf16.xpose.msra.mxu1 %v1112_v63  ;;  %v3309_v22 = vpop.eup %2756 }
 0x4d7   : > { %2671 = vmatprep.subr.msk.bf16.mxu1 %vm507_vm1, %v1093_v1  ;;  %v1280_v42 = vpop.permute.xlu0 %1279 }
 0x4de   : > { %2586 = vmatpush3.bf16.xpose.msra.mxu1 %v1115_v3 }
 0x4eb   : > { %v916_v10 = vpop.xlane.xlu1 %915 }
 0x4ec   : > { %v928_v11 = vsub.f32 %v896_v9, %v916_v10 }
 0x4ee   : > { %v941_v13 = vmul.f32 1.442695, %v928_v11 }
 0x4ef   : > { %v1095_v14 = vpop.permute.xlu1 %1094 }
 0x4f0   : > { %2758 = vpow2.f32 %v941_v13  ;;  %2672 = vmatprep.subr.msk.bf16.mxu1 %vm507_vm1, %v1095_v14  ;;  %v1118_v15 = vsel %vm507_vm1, %v1095_v14, 0 }
 0x4f1   : > { %2760 = vpow2.f32 %v943_v12  ;;  %2588 = vmatpush3.bf16.xpose.msra.mxu1 %v1118_v15 }
 0x4f3   : > { %v1083_v6 = vpop.permute.xlu1 %1082 }
 0x4f7   : > { %v1087_v2 = vpop.permute.xlu1 %1086 }
 0x4fa   : > { %v3311_v9 = vpop.eup %2758 }
 0x4fb   : > { %v3313_v23 = vpop.eup %2760  ;;  %v1278_v24 = vpop.permute.xlu1 %1277  ;;  %v981_v25 = vpack.c.bf16 %v3311_v9, %v3307_v21 }
 0x4fc   : > { %2597 = vmatprep.subr.bf16.mxu0 %v1278_v24  ;;  %v982_v39 = vpack.c.bf16 %v3309_v22, %v3313_v23 }
 0x4fd   : > { %2577 = vmatprep.mubr.msk.bf16.mxu1 %vm383_vm0, %v981_v25  ;;  %2598 = vmatpush3.bf16.msra.mxu0 %v1278_v24 }
 0x4fe   : > { %2578 = vmatmul.mubr.msk.bf16.gmra.mrb[12].mxu1 %vm383_vm0, %v982_v39  ;;  %2599 = vmatprep.subr.bf16.mxu0 %v1280_v42 }
 0x4ff   : > { %2589 = vmatprep.mubr.msk.bf16.mxu1 %vm507_vm1, %v1081_v0  ;;  %v1282_v43 = vpop.permute.xlu1 %1281 }
 0x501   : > { %2600 = vmatpush3.bf16.msra.mxu0 %v1280_v42 }
 0x502   : > { %2601 = vmatprep.subr.bf16.mxu0 %v1282_v43 }
 0x503   : > { %v1284_v41 = vpop.permute.xlu1 %1283 }
 0x505   : > { %2602 = vmatpush3.bf16.msra.mxu0 %v1282_v43 }
 0x506   : > { %2590 = vmatmul.mubr.msk.bf16.vlgmr.msra.gmra.mrb[16].mxu1 %vm507_vm1, %v1083_v6  ;;  %2603 = vmatprep.subr.bf16.mxu0 %v1284_v41 }
 0x507   : > { %2593 = vmatprep.mubr.msk.bf16.mxu1 %vm507_vm1, %v1085_v20  ;;  %v3324_v44 = vpop.permute.xlu1 %1382 }
 0x509   : > { %2604 = vmatpush3.bf16.msra.mxu0 %v1284_v41 }
 0x50a   : > { %2673 = vmatprep.subr.msk.bf16.mxu0 %vm507_vm1, %v3324_v44 }
 0x50e   : > { %2594 = vmatmul.mubr.msk.bf16.gmra.mrb[20].mxu1 %vm507_vm1, %v1087_v2 }
 0x5a0   : > { %v3329_v60 = vpop.f32.mrb[8].mxu1 }
 0x5a1   : > { %v3331_v61 = vpop.f32.mrb[9].mxu1 }
 0x5a2   : > { %v3333_v62 = vpop.f32.mrb[10].mxu1 }
 0x5a3   : > { %v3335_v63 = vpop.f32.mrb[11].mxu1 }
 0x5d1   : > { %v3337_v1 = vpop.f32.mrb[12].mxu1 }
 0x5d2   : > { %v3339_v3 = vpop.f32.mrb[13].mxu1 }
 0x5d3   : > { %v3341_v4 = vpop.f32.mrb[14].mxu1 }
 0x5d4   : > { %v3343_v5 = vpop.f32.mrb[15].mxu1 }
 0x5d9   : > { %v2591_v7 = vpop.f32.mrb[16].mxu1 }
 0x5da   : > { %v1187_v26 = vmul.f32 0.35355338, %v2591_v7  ;;  %v1154_v8 = vpop.f32.mrb[17].mxu1 }
 0x5db   : > { %v2592_v10 = vpop.f32.mrb[18].mxu1  ;;  %v1185_v11 = vmul.f32 0.35355338, %v1154_v8 }
 0x5dc   : > { %v1157_v12 = vpop.f32.mrb[19].mxu1  ;;  %v1199_v13 = vsel %vm383_vm0, %v1187_v26, -inf  ;;  %v1188_v0 = vmul.f32 0.35355338, %v2592_v10 }
 0x5dd   : > { %v1186_v14 = vmul.f32 0.35355338, %v1157_v12  ;;  %1200 = vmax.xlane.f32.xlu0 %v1199_v13  ;;  %v1193_v6 = vsel %vm383_vm0, %v1185_v11, -inf }
 0x5de   : > { %v1202_v42 = vsel %vm383_vm0, %v1188_v0, -inf }
 0x5df   : > { %v1196_v15 = vsel %vm383_vm0, %v1186_v14, -inf }
 0x5e0   : > { %1197 = vmax.xlane.f32.xlu1 %v1196_v15 }
 0x5e1   : > { %1194 = vmax.xlane.f32.xlu0 %v1193_v6  ;;  %v2595_v20 = vpop.f32.mrb[20].mxu1 }
 0x5e2   : > { %v1170_v2 = vpop.f32.mrb[21].mxu1  ;;  %v3348_v25 = vmul.f32 0.35355338, %v2595_v20 }
 0x5e3   : > { %v2596_v24 = vpop.f32.mrb[22].mxu1  ;;  %v1189_v43 = vmul.f32 0.35355338, %v1170_v2 }
 0x5e4   : > { %v1173_v39 = vpop.f32.mrb[23].mxu1  ;;  %v1211_v41 = vsel %vm383_vm0, %v3348_v25, -inf  ;;  %v1192_v7 = vmul.f32 0.35355338, %v2596_v24 }
 0x5e5   : > { %1203 = vmax.xlane.f32.xlu0 %v1202_v42  ;;  %v1205_v8 = vsel %vm383_vm0, %v1189_v43, -inf  ;;  %v1190_v12 = vmul.f32 0.35355338, %v1173_v39 }
 0x5e6   : > { %v1214_v10 = vsel %vm383_vm0, %v1192_v7, -inf }
 0x5e7   : > { %v1208_v13 = vsel %vm383_vm0, %v1190_v12, -inf }
 0x5e9   : > { %1212 = vmax.xlane.f32.xlu0 %v1211_v41 }
 0x5ed   : > { %1206 = vmax.xlane.f32.xlu0 %v1205_v8 }
 0x5f1   : > { %1386 = vrot.lane.b32.xlu1 %v3109_v52, %s2930_s25  ;;  %1215 = vmax.xlane.f32.xlu0 %v1214_v10 }
 0x607   : > { %1384 = vrot.lane.b32.xlu0 %v3096_v46, %s2930_s25 }
 0x60b   : > { %1374 = vrot.lane.b32.xlu0 %v3087_v37, %s2931_s26 }
 0x60f   : > { %1378 = vrot.lane.b32.xlu0 %v3109_v52, %s2931_s26 }
 0x615   : > { %1209 = vmax.xlane.f32.xlu1 %v1208_v13 }
 0x626   : > { %1388 = vrot.lane.b32.xlu1 %v3113_v53, %s2930_s25 }
 0x62a   : > { %1376 = vrot.lane.b32.xlu1 %v3096_v46, %s2931_s26 }
 0x62e   : > { %1380 = vrot.lane.b32.xlu1 %v3113_v53, %s2931_s26  ;;  %s350_s26 = sand.u32 1, %s2912_s14  }
 0x62f   : > { %s3996_s17 = scalar_lea.sflag [#allocation4], %s350_s26 }
 0x632   : > { %1571 = vrot.lane.b32.xlu1 %v3087_v37, %s2932_s27 }
 0x66a   : > { %v1201_v15 = vpop.xlane.xlu0 %1200 }
 0x66b   : > { %v1219_v20 = vsub.f32 %v1187_v26, %v1201_v15 }
 0x66d   : > { %v1198_v6 = vpop.xlane.xlu1 %1197  ;;  %v1229_v8 = vmul.f32 1.442695, %v1219_v20 }
 0x66e   : > { %v1218_v2 = vsub.f32 %v1186_v14, %v1198_v6  ;;  %v1195_v24 = vpop.xlane.xlu0 %1194 }
 0x66f   : > { %v1217_v39 = vsub.f32 %v1185_v11, %v1195_v24 }
 0x670   : > { %v1227_v42 = vmul.f32 1.442695, %v1218_v2 }
 0x671   : > { %v1225_v41 = vmul.f32 1.442695, %v1217_v39  ;;  %v1387_v2 = vpop.permute.xlu1 %1386 }
 0x672   : > { %2762 = vpow2.f32 %v1227_v42  ;;  %v1204_v10 = vpop.xlane.xlu0 %1203  ;;  %v1409_v24 = vsel %vm507_vm1, %v1387_v2, 0 }
 0x673   : > { %2764 = vpow2.f32 %v1225_v41  ;;  %v1220_v13 = vsub.f32 %v1188_v0, %v1204_v10 }
 0x674   : > { %2766 = vpow2.f32 %v1229_v8 }
 0x675   : > { %v1231_v33 = vmul.f32 1.442695, %v1220_v13 }
 0x676   : > { %v1213_v31 = vpop.xlane.xlu0 %1212 }
 0x677   : > { %2768 = vpow2.f32 %v1231_v33  ;;  %v1403_v33 = vsel %vm507_vm1, %v3324_v44, 0  ;;  %v1223_v41 = vsub.f32 %v3348_v25, %v1213_v31 }
 0x67a   : > { %v1207_v38 = vpop.xlane.xlu0 %1206 }
 0x67b   : > { %v1221_v39 = vsub.f32 %v1189_v43, %v1207_v38 }
 0x67c   : > { %v3368_v32 = vpop.eup %2762 }
 0x67d   : > { %v3370_v37 = vpop.eup %2764  ;;  %v1233_v44 = vmul.f32 1.442695, %v1221_v39 }
 0x67e   : > { %v1273_v26 = vpack.c.bf16 %v3368_v32, %v3370_v37  ;;  %v1216_v11 = vpop.xlane.xlu0 %1215  ;;  %v3374_v14 = vpop.eup %2766 }
 0x67f   : > { %v1224_v42 = vsub.f32 %v1192_v7, %v1216_v11  ;;  %2770 = vpow2.f32 %v1233_v44 }
 0x680   : > { %2605 = vmatprep.mubr.msk.bf16.mxu0 %vm383_vm0, %v1273_v26  ;;  %v1237_v26 = vmul.f32 1.442695, %v1223_v41 }
 0x681   : > { %v3377_v15 = vpop.eup %2768  ;;  %v1239_v8 = vmul.f32 1.442695, %v1224_v42 }
 0x682   : > { %v1274_v0 = vpack.c.bf16 %v3377_v15, %v3374_v14  ;;  %v1385_v6 = vpop.permute.xlu0 %1384 }
 0x683   : > { %v1406_v20 = vsel %vm507_vm1, %v1385_v6, 0  ;;  %2772 = vpow2.f32 %v1239_v8 }
 0x684   : > { %2606 = vmatmul.mubr.msk.bf16.vlgmr.msra.gmra.mrb[24].mxu0 %vm383_vm0, %v1274_v0 }
 0x685   : > { %2614 = vmatpush3.bf16.xpose.msra.mxu0 %v1403_v33 }
 0x686   : > { %2674 = vmatprep.subr.msk.bf16.mxu0 %vm507_vm1, %v1385_v6 }
 0x689   : > { %v3391_v7 = vpop.eup %2770 }
 0x68d   : > { %2616 = vmatpush3.bf16.xpose.msra.mxu0 %v1406_v20  ;;  %v3393_v31 = vpop.eup %2772 }
 0x68e   : > { %2675 = vmatprep.subr.msk.bf16.mxu0 %vm507_vm1, %v1387_v2 }
 0x695   : > { %2618 = vmatpush3.bf16.xpose.msra.mxu0 %v1409_v24  ;;  %v1375_v24 = vpop.permute.xlu0 %1374 }
 0x699   : > { %v1379_v39 = vpop.permute.xlu0 %1378 }
 0x6a2   : > { %v1210_v10 = vpop.xlane.xlu1 %1209 }
 0x6a3   : > { %v1222_v13 = vsub.f32 %v1190_v12, %v1210_v10 }
 0x6a5   : > { %v1235_v0 = vmul.f32 1.442695, %v1222_v13 }
 0x6a6   : > { %v1389_v33 = vpop.permute.xlu1 %1388 }
 0x6a7   : > { %2774 = vpow2.f32 %v1235_v0  ;;  %v1412_v6 = vsel %vm507_vm1, %v1389_v33, 0  ;;  %2676 = vmatprep.subr.msk.bf16.mxu0 %vm507_vm1, %v1389_v33 }
 0x6a8   : > { %2776 = vpow2.f32 %v1237_v26  ;;  %2620 = vmatpush3.bf16.xpose.msra.mxu0 %v1412_v6 }
 0x6aa   : > { %v1377_v38 = vpop.permute.xlu1 %1376 }
 0x6ae   : > { %v1381_v43 = vpop.permute.xlu1 %1380 }
 0x6b1   : > { %v3395_v25 = vpop.eup %2774 }
 0x6b2   : > { %v3397_v12 = vpop.eup %2776  ;;  %v1572_v11 = vpop.permute.xlu1 %1571  ;;  %v1275_v20 = vpack.c.bf16 %v3395_v25, %v3391_v7 }
 0x6b3   : > { %2629 = vmatprep.subr.bf16.mxu1 %v1572_v11  ;;  %v1276_v2 = vpack.c.bf16 %v3393_v31, %v3397_v12 }
 0x6b4   : > { %2609 = vmatprep.mubr.msk.bf16.mxu0 %vm383_vm0, %v1275_v20  ;;  %2630 = vmatpush3.bf16.msra.mxu1 %v1572_v11 }
 0x6b5   : > { %2610 = vmatmul.mubr.msk.bf16.gmra.mrb[28].mxu0 %vm383_vm0, %v1276_v2 }
 0x6b6   : > { %2621 = vmatprep.mubr.msk.bf16.mxu0 %vm507_vm1, %v1375_v24 }
 0x6bd   : > { %2622 = vmatmul.mubr.msk.bf16.vlgmr.msra.gmra.mrb[32].mxu0 %vm507_vm1, %v1377_v38 }
 0x6be   : > { %2625 = vmatprep.mubr.msk.bf16.mxu0 %vm507_vm1, %v1379_v39 }
 0x6c5   : > { %2626 = vmatmul.mubr.msk.bf16.gmra.mrb[36].mxu0 %vm507_vm1, %v1381_v43 }
 0x757   : > { %v3409_v42 = vpop.f32.mrb[24].mxu0 }
 0x758   : > { %v3411_v41 = vpop.f32.mrb[25].mxu0 }
 0x759   : > { %v3413_v44 = vpop.f32.mrb[26].mxu0 }
 0x75a   : > { %v3415_v8 = vpop.f32.mrb[27].mxu0 }
 0x788   : > { %v3417_v10 = vpop.f32.mrb[28].mxu0 }
 0x789   : > { %v3419_v13 = vpop.f32.mrb[29].mxu0 }
 0x78a   : > { %v3421_v26 = vpop.f32.mrb[30].mxu0 }
 0x78b   : > { %4058 = vst [vmem:[#allocation14_spill] sm:$0xff] %v3421_v26  ;;  %v3423_v0 = vpop.f32.mrb[31].mxu0 }
 0x78c   : > { %4059 = vst [vmem:[#allocation15_spill] sm:$0xff] %v3423_v0 }
 0x790   : > { %v2623_v33 = vpop.f32.mrb[32].mxu0 }
 0x791   : > { %v3425_v6 = vmul.f32 0.35355338, %v2623_v33  ;;  %v1448_v38 = vpop.f32.mrb[33].mxu0 }
 0x792   : > { %v2624_v43 = vpop.f32.mrb[34].mxu0  ;;  %v3427_v11 = vmul.f32 0.35355338, %v1448_v38 }
 0x793   : > { %v1451_v20 = vpop.f32.mrb[35].mxu0  ;;  %v1493_v2 = vsel %vm383_vm0, %v3425_v6, -inf  ;;  %v3433_v39 = vmul.f32 0.35355338, %v2624_v43 }
 0x794   : > { %v3431_v24 = vmul.f32 0.35355338, %v1451_v20  ;;  %1494 = vmax.xlane.f32.xlu0 %v1493_v2  ;;  %v1487_v33 = vsel %vm383_vm0, %v3427_v11, -inf }
 0x795   : > { %v1496_v20 = vsel %vm383_vm0, %v3433_v39, -inf }
 0x796   : > { %v1490_v29 = vsel %vm383_vm0, %v3431_v24, -inf }
 0x797   : > { %1491 = vmax.xlane.f32.xlu1 %v1490_v29 }
 0x798   : > { %1488 = vmax.xlane.f32.xlu0 %v1487_v33  ;;  %v2627_v27 = vpop.f32.mrb[36].mxu0 }
 0x799   : > { %v3439_v38 = vmul.f32 0.35355338, %v2627_v27  ;;  %v1464_v30 = vpop.f32.mrb[37].mxu0 }
 0x79a   : > { %v2628_v26 = vpop.f32.mrb[38].mxu0  ;;  %v3443_v28 = vmul.f32 0.35355338, %v1464_v30 }
 0x79b   : > { %v3445_v43 = vmul.f32 0.35355338, %v2628_v26  ;;  %v1467_v2 = vpop.f32.mrb[39].mxu0  ;;  %v1505_v29 = vsel %vm383_vm0, %v3439_v38, -inf  ;;  %v950_v26 = vsel %vm383_vm0, %v3282_v45, 0.0  ;;  %v959_v45 = vsel %vm383_vm0, %v3307_v21, 0.0 }
 0x79c   : > { %1497 = vmax.xlane.f32.xlu0 %v1496_v20  ;;  %1506 = vmax.xlane.f32.xlu1 %v1505_v29  ;;  %v3449_v0 = vmul.f32 0.35355338, %v1467_v2  ;;  %v1499_v27 = vsel %vm383_vm0, %v3443_v28, -inf  ;;  %v947_v20 = vsel %vm383_vm0, %v3284_v55, 0.0  ;;  %v1241_v2 = vsel %vm383_vm0, %v3370_v37, 0.0 }
 0x79d   : > { %v1508_v33 = vsel %vm383_vm0, %v3445_v43, -inf  ;;  %v1244_v55 = vsel %vm383_vm0, %v3368_v32, 0.0  ;;  %v1250_v37 = vsel %vm383_vm0, %v3377_v15, 0.0  ;;  %v1259_v32 = vsel %vm383_vm0, %v3397_v12, 0.0 }
 0x79e   : > { %v1502_v30 = vsel %vm383_vm0, %v3449_v0, -inf  ;;  %v968_v21 = vsel %vm383_vm0, %v3309_v22, 0.0  ;;  %v1256_v15 = vsel %vm383_vm0, %v3395_v25, 0.0  ;;  %v659_v22 = vsel %vm383_vm0, %v3188_v57, 0.0 }
 0x79f   : > { %v2933_v12 = vmov 0.0  }
 0x7a0   : > { %1500 = vmax.xlane.f32.xlu1 %v1499_v27  ;;  %1509 = vmax.xlane.f32.xlu0 %v1508_v33  ;;  %1794 = vst.msk [vmem:[#allocation2 + $0x10] sm:$0xff] %vm383_vm0, %v2933_v12  ;;  %1791 = vst.msk [vmem:[#allocation2] sm:$0xff] %vm383_vm0, %v2933_v12 }
 0x7a1   : > { %1795 = vst.msk [vmem:[#allocation2 + $0x18] sm:$0x3] %vm1792_vm2, %v2933_v12  ;;  %1793 = vst.msk [vmem:[#allocation2 + $0x8] sm:$0x3] %vm1792_vm2, %v2933_v12 }
 0x7a2   : > { %1796 = vst.msk [vmem:[#allocation2 + $0x20] sm:$0xff] %vm383_vm0, %v2933_v12  ;;  %1798 = vst.msk [vmem:[#allocation2 + $0x30] sm:$0xff] %vm383_vm0, %v2933_v12 }
 0x7a3   : > { %1797 = vst.msk [vmem:[#allocation2 + $0x28] sm:$0x3] %vm1792_vm2, %v2933_v12  ;;  %1799 = vst.msk [vmem:[#allocation2 + $0x38] sm:$0x3] %vm1792_vm2, %v2933_v12 }
 0x7a4   : > { %1503 = vmax.xlane.f32.xlu0 %v1502_v30  ;;  %1800 = vst.msk [vmem:[#allocation2 + $0x40] sm:$0xff] %vm383_vm0, %v2933_v12  ;;  %1802 = vst.msk [vmem:[#allocation2 + $0x50] sm:$0xff] %vm383_vm0, %v2933_v12 }
 0x7a5   : > { %1801 = vst.msk [vmem:[#allocation2 + $0x48] sm:$0x3] %vm1792_vm2, %v2933_v12  ;;  %1803 = vst.msk [vmem:[#allocation2 + $0x58] sm:$0x3] %vm1792_vm2, %v2933_v12 }
 0x7a6   : > { %1804 = vst.msk [vmem:[#allocation2 + $0x60] sm:$0xff] %vm383_vm0, %v2933_v12  ;;  %1806 = vst.msk [vmem:[#allocation2 + $0x70] sm:$0xff] %vm383_vm0, %v2933_v12 }
 0x7a7   : > { %1805 = vst.msk [vmem:[#allocation2 + $0x68] sm:$0x3] %vm1792_vm2, %v2933_v12  ;;  %1807 = vst.msk [vmem:[#allocation2 + $0x78] sm:$0x3] %vm1792_vm2, %v2933_v12 }
 0x7a8   : > { %1808 = vst.msk [vmem:[#allocation2 + $0x80] sm:$0xff] %vm383_vm0, %v2933_v12  ;;  %1810 = vst.msk [vmem:[#allocation2 + $0x90] sm:$0xff] %vm383_vm0, %v2933_v12 }
 0x7a9   : > { %1809 = vst.msk [vmem:[#allocation2 + $0x88] sm:$0x3] %vm1792_vm2, %v2933_v12  ;;  %1811 = vst.msk [vmem:[#allocation2 + $0x98] sm:$0x3] %vm1792_vm2, %v2933_v12 }
 0x7b1   : > { %1575 = vrot.lane.b32.xlu1 %v3109_v52, %s2932_s27  ;;  %v953_v52 = vsel %vm383_vm0, %v3288_v56, 0.0  ;;  %v965_v56 = vsel %vm383_vm0, %v3313_v23, 0.0  ;;  %v653_v23 = vsel %vm383_vm0, %v3184_v54, 0.0  ;;  %v662_v54 = vsel %vm383_vm0, %v3191_v58, 0.0 }
 0x7b5   : > { %1577 = vrot.lane.b32.xlu1 %v3113_v53, %s2932_s27  ;;  %v1247_v53 = vsel %vm383_vm0, %v3374_v14, 0.0  ;;  %v962_v14 = vsel %vm383_vm0, %v3311_v9, 0.0  ;;  %v1262_v9 = vsel %vm383_vm0, %v3393_v31, 0.0 }
 0x7ba   : > { %1573 = vrot.lane.b32.xlu0 %v3096_v46, %s2932_s27  ;;  %v956_v46 = vsel %vm383_vm0, %v3291_v59, 0.0  ;;  %v1253_v59 = vsel %vm383_vm0, %v3391_v7, 0.0  ;;  %v656_v7 = vsel %vm383_vm0, %v3182_v48, 0.0 }
 0x7d9   : > { %951 = vadd.xlane.f32.xlu1 %v950_v26  ;;  %948 = vadd.xlane.f32.xlu0 %v947_v20 }
 0x7dd   : > { %1242 = vadd.xlane.f32.xlu1 %v1241_v2  ;;  %954 = vadd.xlane.f32.xlu0 %v953_v52 }
 0x7e1   : > { %1248 = vadd.xlane.f32.xlu1 %v1247_v53  ;;  %957 = vadd.xlane.f32.xlu0 %v956_v46 }
 0x7e5   : > { %960 = vadd.xlane.f32.xlu1 %v959_v45  ;;  %1245 = vadd.xlane.f32.xlu0 %v1244_v55  ;;  %v665_v45 = vsel %vm383_vm0, %v3207_v16, 0.0 }
 0x7e9   : > { %966 = vadd.xlane.f32.xlu1 %v965_v56  ;;  %1251 = vadd.xlane.f32.xlu0 %v1250_v37 }
 0x7ed   : > { %1254 = vadd.xlane.f32.xlu1 %v1253_v59  ;;  %963 = vadd.xlane.f32.xlu0 %v962_v14 }
 0x7f1   : > { %1260 = vadd.xlane.f32.xlu1 %v1259_v32  ;;  %969 = vadd.xlane.f32.xlu0 %v968_v21 }
 0x7f5   : > { %654 = vadd.xlane.f32.xlu1 %v653_v23  ;;  %1257 = vadd.xlane.f32.xlu0 %v1256_v15 }
 0x7f9   : > { %1263 = vadd.xlane.f32.xlu0 %v1262_v9 }
 0x7fd   : > { %657 = vadd.xlane.f32.xlu0 %v656_v7 }
 0x801   : > { %660 = vadd.xlane.f32.xlu0 %v659_v22 }
 0x805   : > { %663 = vadd.xlane.f32.xlu0 %v662_v54 }
 0x806   : > { %1820 = vrot.lane.b32.xlu1 %v3079_v34, %s2923_s29 }
 0x80a   : > { %1824 = vrot.lane.b32.xlu1 %v3089_v40, %s2923_s29 }
 0x80e   : > { %1826 = vrot.lane.b32.xlu1 %v3083_v36, %s2923_s29 }
 0x81b   : > { %1822 = vrot.lane.b32.xlu0 %v3081_v35, %s2923_s29 }
 0x821   : > { %v1495_v48 = vpop.xlane.xlu0 %1494 }
 0x822   : > { %v1513_v57 = vsub.f32 %v3425_v6, %v1495_v48 }
 0x824   : > { %v1523_v58 = vmul.f32 1.442695, %v1513_v57  ;;  %v1492_v31 = vpop.xlane.xlu1 %1491 }
 0x825   : > { %v1512_v25 = vsub.f32 %v3431_v24, %v1492_v31  ;;  %v1489_v29 = vpop.xlane.xlu0 %1488 }
 0x826   : > { %v1511_v27 = vsub.f32 %v3427_v11, %v1489_v29  ;;  %2778 = vpow2.f32 %v1523_v58 }
 0x827   : > { %v1521_v34 = vmul.f32 1.442695, %v1512_v25  ;;  %v668_v25 = vsel %vm383_vm0, %v3211_v18, 0.0 }
 0x828   : > { %v1519_v33 = vmul.f32 1.442695, %v1511_v27  ;;  %v671_v27 = vsel %vm383_vm0, %v3213_v19, 0.0 }
 0x829   : > { %2780 = vpow2.f32 %v1521_v34  ;;  %v1498_v40 = vpop.xlane.xlu0 %1497  ;;  %v1507_v30 = vpop.xlane.xlu1 %1506  ;;  %v674_v34 = vsel %vm383_vm0, %v3209_v17, 0.0 }
 0x82a   : > { %2782 = vpow2.f32 %v1519_v33  ;;  %v1514_v36 = vsub.f32 %v3433_v39, %v1498_v40  ;;  %v1517_v35 = vsub.f32 %v3439_v38, %v1507_v30 }
 0x82c   : > { %v1525_v26 = vmul.f32 1.442695, %v1514_v36  ;;  %v1531_v6 = vmul.f32 1.442695, %v1517_v35 }
 0x82d   : > { %v1510_v20 = vpop.xlane.xlu0 %1509  ;;  %v1501_v2 = vpop.xlane.xlu1 %1500 }
 0x82e   : > { %2784 = vpow2.f32 %v1525_v26  ;;  %v1518_v24 = vsub.f32 %v3445_v43, %v1510_v20  ;;  %v1515_v11 = vsub.f32 %v3443_v28, %v1501_v2 }
 0x82f   : > { %2786 = vpow2.f32 %v1531_v6 }
 0x830   : > { %v1533_v52 = vmul.f32 1.442695, %v1518_v24  ;;  %v1527_v53 = vmul.f32 1.442695, %v1515_v11  ;;  %v2779_v55 = vpop.eup %2778 }
 0x831   : > { %v1504_v46 = vpop.xlane.xlu0 %1503  ;;  %v1576_v59 = vpop.permute.xlu1 %1575  ;;  %v1541_v28 = vsel %vm383_vm0, %v2779_v55, 0.0 }
 0x832   : > { %v1516_v39 = vsub.f32 %v3449_v0, %v1504_v46  ;;  %666 = vadd.xlane.f32.xlu1 %v665_v45  ;;  %2788 = vpow2.f32 %v1533_v52 }
 0x833   : > { %v2781_v38 = vpop.eup %2780  ;;  %2790 = vpow2.f32 %v1527_v53 }
 0x834   : > { %v2783_v56 = vpop.eup %2782  ;;  %v1529_v37 = vmul.f32 1.442695, %v1516_v39  ;;  %v1538_v9 = vsel %vm383_vm0, %v2781_v38, 0.0 }
 0x835   : > { %v1574_v43 = vpop.permute.xlu0 %1573  ;;  %v1567_v14 = vpack.c.bf16 %v2781_v38, %v2783_v56  ;;  %v1535_v0 = vsel %vm383_vm0, %v2783_v56, 0.0  ;;  %v1578_v23 = vpop.permute.xlu1 %1577 }
 0x836   : > { %2792 = vpow2.f32 %v1529_v37  ;;  %1542 = vadd.xlane.f32.xlu1 %v1541_v28  ;;  %2631 = vmatprep.subr.bf16.mxu1 %v1574_v43 }
 0x837   : > { %2632 = vmatpush3.bf16.msra.mxu1 %v1574_v43  ;;  %2637 = vmatprep.mubr.msk.bf16.mxu1 %vm383_vm0, %v1567_v14 }
 0x838   : > { %v2785_v16 = vpop.eup %2784  ;;  %2633 = vmatprep.subr.bf16.mxu1 %v1576_v59 }
 0x839   : > { %v1544_v32 = vsel %vm383_vm0, %v2785_v16, 0.0  ;;  %v2787_v21 = vpop.eup %2786  ;;  %v1568_v12 = vpack.c.bf16 %v2785_v16, %v2779_v55 }
 0x83a   : > { %1536 = vadd.xlane.f32.xlu1 %v1535_v0  ;;  %1545 = vadd.xlane.f32.xlu0 %v1544_v32  ;;  %v1553_v7 = vsel %vm383_vm0, %v2787_v21, 0.0 }
 0x83b   : > { %2634 = vmatpush3.bf16.msra.mxu1 %v1576_v59 }
 0x83c   : > { %2635 = vmatprep.subr.bf16.mxu1 %v1578_v23  ;;  %v2789_v15 = vpop.eup %2788 }
 0x83d   : > { %v2791_v22 = vpop.eup %2790  ;;  %v1556_v48 = vsel %vm383_vm0, %v2789_v15, 0.0  ;;  %v1570_v29 = vpack.c.bf16 %v2789_v15, %v2787_v21 }
 0x83e   : > { %1539 = vadd.xlane.f32.xlu0 %v1538_v9  ;;  %1554 = vadd.xlane.f32.xlu1 %v1553_v7  ;;  %v1547_v57 = vsel %vm383_vm0, %v2791_v22, 0.0 }
 0x83f   : > { %2636 = vmatpush3.bf16.msra.mxu1 %v1578_v23 }
 0x840   : > { %v2793_v54 = vpop.eup %2792 }
 0x841   : > { %v1569_v58 = vpack.c.bf16 %v2793_v54, %v2791_v22  ;;  %v1550_v31 = vsel %vm383_vm0, %v2793_v54, 0.0 }
 0x842   : > { %1557 = vadd.xlane.f32.xlu0 %v1556_v48  ;;  %1548 = vadd.xlane.f32.xlu1 %v1547_v57 }
 0x843   : > { %2638 = vmatmul.mubr.msk.bf16.vlgmr.msra.gmra.mrb[24].mxu1 %vm383_vm0, %v1568_v12  ;;  %v4060_v12 = vld [vmem:[#allocation15_spill] sm:$0xff] }
 0x844   : > { %2641 = vmatprep.mubr.msk.bf16.mxu1 %vm383_vm0, %v1569_v58  ;;  %v4062_v58 = vld [vmem:[#allocation14_spill] sm:$0xff] }
 0x846   : > { %1551 = vadd.xlane.f32.xlu0 %v1550_v31 }
 0x84a   : > { %669 = vadd.xlane.f32.xlu0 %v668_v25 }
 0x84b   : > { %2642 = vmatmul.mubr.msk.bf16.gmra.mrb[28].mxu1 %vm383_vm0, %v1570_v29 }
 0x84e   : > { %672 = vadd.xlane.f32.xlu0 %v671_v27  ;;  %v4063_v27 = vld [vmem:[#allocation9_spill] sm:$0xff] }
 0x852   : > { %675 = vadd.xlane.f32.xlu0 %v674_v34 }
 0x853   : > { %1828 = vrot.lane.b32.xlu1 %v3098_v47, %s2923_s29 }
 0x857   : > { %1832 = vrot.lane.b32.xlu1 %v3100_v49, %s2923_s29 }
 0x85b   : > { %1834 = vrot.lane.b32.xlu1 %v3102_v50, %s2923_s29 }
 0x866   : > { %v949_v18 = vpop.xlane.xlu0 %948  ;;  %v952_v33 = vpop.xlane.xlu1 %951 }
 0x867   : > { %2794 = vrcp.f32 %v949_v18 }
 0x868   : > { %1830 = vrot.lane.b32.xlu0 %v3104_v51, %s2923_s29  ;;  %2796 = vrcp.f32 %v952_v33  ;;  %v4064_v33 = vld [vmem:[#allocation6_spill] sm:$0xff]  ;;  %s2356_s29 = sshll.u32 %s350_s26, 6 }
 0x869   : > { %s352_s30 = scalar_lea.vmem [#allocation3], %s2356_s29  ;;  %s2934_s29 = smov [#allocation3]  }
 0x86a   : > { %v955_v19 = vpop.xlane.xlu0 %954  ;;  %v1243_v40 = vpop.xlane.xlu1 %1242  ;;  %s2290_s18 = sshll.u32 %s352_s30, 4  ;;  %s3989_s18 = int_to_ptr.vmem [resolvable:$true] %s2290_s18 }
 0x86b   : > { %2798 = vrcp.f32 %v955_v19  ;;  %s2858_s28 = scalar_lea.vmem %s3989_s18, 1024 }
 0x86c   : > { %2800 = vrcp.f32 %v1243_v40  ;;  %p2859_p11 = scmp.ne.s32.totalorder %s3989_s18, %s2858_s28 }
 0x86e   : > { %v958_v17 = vpop.xlane.xlu0 %957  ;;  %v1249_v30 = vpop.xlane.xlu1 %1248  ;;  %p2860_p12 = pnand %p2859_p11, %p3030_p5 }
 0x86f   : > { %2802 = vrcp.f32 %v958_v17  ;;  %v4065_v17 = vld [vmem:[#allocation8_spill] sm:$0xff] }
 0x870   : > { %2804 = vrcp.f32 %v1249_v30  ;;  %p2861_p13 = pneg %p2860_p12 }
 0x871   : > { %v2795_v47 = vpop.eup %2794 }
 0x872   : > { %v1246_v49 = vpop.xlane.xlu0 %1245  ;;  %v961_v36 = vpop.xlane.xlu1 %960  ;;  %v1072_v50 = vmul.f32 %v2795_v47, %v3331_v61  ;;  %v2149_v47 = vld [vmem:[%s4044_s7] sm:$0xff] }
 0x873   : > { %v2797_v35 = vpop.eup %2796  ;;  %2806 = vrcp.f32 %v1246_v49  ;;  %v2150_v49 = vld [vmem:[%s4044_s7 + $0x8] sm:$0xff] }
 0x874   : > { %1676 = vrot.lane.b32.xlu1 %v1072_v50, %s2932_s27  ;;  %2808 = vrcp.f32 %v961_v36  ;;  %v1073_v2 = vmul.f32 %v2797_v35, %v3335_v63  ;;  %v2157_v36 = vpack.c.bf16 %v2150_v49, %v2149_v47 }
 0x875   : > { %v2799_v26 = vpop.eup %2798 }
 0x876   : > { %v1252_v51 = vpop.xlane.xlu0 %1251  ;;  %v967_v6 = vpop.xlane.xlu1 %966  ;;  %v1074_v20 = vmul.f32 %v2799_v26, %v3329_v60  ;;  %2645 = vmatprep.subr.bf16.mxu1 %v2157_v36 }
 0x877   : > { %v2801_v24 = vpop.eup %2800  ;;  %2810 = vrcp.f32 %v1252_v51  ;;  %2646 = vmatpush3.bf16.msra.mxu1 %v2157_v36 }
 0x878   : > { %1680 = vrot.lane.b32.xlu0 %v1074_v20, %s2932_s27  ;;  %1678 = vrot.lane.b32.xlu1 %v1073_v2, %s2932_s27  ;;  %2812 = vrcp.f32 %v967_v6  ;;  %v1366_v46 = vmul.f32 %v2801_v24, %v3411_v41  ;;  %v4066_v24 = vld [vmem:[#allocation11_spill] sm:$0xff] }
 0x879   : > { %v2803_v11 = vpop.eup %2802 }
 0x87a   : > { %v964_v61 = vpop.xlane.xlu0 %963  ;;  %v1255_v52 = vpop.xlane.xlu1 %1254  ;;  %v1075_v53 = vmul.f32 %v2803_v11, %v3333_v62 }
 0x87b   : > { %v2805_v45 = vpop.eup %2804  ;;  %2814 = vrcp.f32 %v964_v61 }
 0x87c   : > { %1682 = vrot.lane.b32.xlu1 %v1075_v53, %s2932_s27  ;;  %1708 = vrot.lane.b32.xlu0 %v1366_v46, %s2929_s21  ;;  %2816 = vrcp.f32 %v1255_v52  ;;  %v1368_v38 = vmul.f32 %v2805_v45, %v3409_v42 }
 0x87d   : > { %v2807_v60 = vpop.eup %2806 }
 0x87e   : > { %v970_v63 = vpop.xlane.xlu0 %969  ;;  %v1261_v55 = vpop.xlane.xlu1 %1260  ;;  %v1367_v39 = vmul.f32 %v2807_v60, %v3415_v8 }
 0x87f   : > { %v2809_v56 = vpop.eup %2808  ;;  %2818 = vrcp.f32 %v970_v63 }
 0x880   : > { %2820 = vrcp.f32 %v1261_v55  ;;  %1710 = vrot.lane.b32.xlu1 %v1367_v39, %s2929_s21  ;;  %1712 = vrot.lane.b32.xlu0 %v1368_v38, %s2929_s21  ;;  %v1076_v43 = vmul.f32 %v2809_v56, %v3339_v3 }
 0x881   : > { %v2811_v62 = vpop.eup %2810 }
 0x882   : > { %v1258_v41 = vpop.xlane.xlu0 %1257  ;;  %v655_v37 = vpop.xlane.xlu1 %654  ;;  %v1369_v59 = vmul.f32 %v2811_v62, %v3413_v44  ;;  %v4067_v62 = vld [vmem:[#allocation13_spill] sm:$0xff] }
 0x883   : > { %v2813_v28 = vpop.eup %2812  ;;  %2822 = vrcp.f32 %v1258_v41 }
 0x884   : > { %2824 = vrcp.f32 %v655_v37  ;;  %1714 = vrot.lane.b32.xlu1 %v1369_v59, %s2929_s21  ;;  %1684 = vrot.lane.b32.xlu0 %v1076_v43, %s2932_s27  ;;  %v1078_v0 = vmul.f32 %v2813_v28, %v3337_v1  ;;  %v4068_v59 = vld [vmem:[#allocation10_spill] sm:$0xff] }
 0x885   : > { %v2815_v42 = vpop.eup %2814 }
 0x886   : > { %v1264_v8 = vpop.xlane.xlu0 %1263  ;;  %v1821_v14 = vpop.permute.xlu1 %1820  ;;  %v1077_v16 = vmul.f32 %v2815_v42, %v3343_v5  ;;  %v4070_v42 = vld [vmem:[#allocation12_spill] sm:$0xff] }
 0x887   : > { %v2817_v32 = vpop.eup %2816  ;;  %2826 = vrcp.f32 %v1264_v8  ;;  %1845 = vst.msk [vmem:[#allocation2 + $0x11] sm:$0xff] %vm383_vm0, %v1821_v14  ;;  %v2151_v14 = vld [vmem:[%s4044_s7 + $0x10] sm:$0xff] }
 0x888   : > { %1686 = vrot.lane.b32.xlu1 %v1077_v16, %s2932_s27  ;;  %1688 = vrot.lane.b32.xlu0 %v1078_v0, %s2932_s27  ;;  %v1370_v9 = vmul.f32 %v2817_v32, %v3419_v13  ;;  %v2152_v16 = vld [vmem:[%s4044_s7 + $0x18] sm:$0xff]  ;;  %v2153_v32 = vld [vmem:[%s4044_s7 + $0x20] sm:$0xff] }
 0x889   : > { %v2819_v3 = vpop.eup %2818  ;;  %v2158_v0 = vpack.c.bf16 %v2152_v16, %v2151_v14  ;;  %v3710_v16 = vld [vmem:[%s4041_s4 + $0x3] ss:$0 sm:$0xff] }
 0x88a   : > { %v2821_v44 = vpop.eup %2820  ;;  %v658_v21 = vpop.xlane.xlu0 %657  ;;  %v1079_v15 = vmul.f32 %v2819_v3, %v3341_v4  ;;  %v4061_v4 = vld [vmem:[#allocation7_spill] sm:$0xff] }
 0x88b   : > { %v1825_v23 = vpop.permute.xlu1 %1824  ;;  %2828 = vrcp.f32 %v658_v21  ;;  %v3594_v1 = vmul.f32 %v2821_v44, %v3417_v10  ;;  %2647 = vmatprep.subr.bf16.mxu1 %v2158_v0  ;;  %v2154_v3 = vld [vmem:[%s4044_s7 + $0x28] sm:$0xff]  ;;  %v2155_v21 = vld [vmem:[%s4044_s7 + $0x30] sm:$0xff] }
 0x88c   : > { %1847 = vst.msk [vmem:[#allocation2 + $0x31] sm:$0xff] %vm383_vm0, %v1825_v23  ;;  %1690 = vrot.lane.b32.xlu1 %v1079_v15, %s2932_s27  ;;  %1716 = vrot.lane.b32.xlu0 %v1370_v9, %s2929_s21  ;;  %v2159_v44 = vpack.c.bf16 %v2154_v3, %v2153_v32  ;;  %v2156_v23 = vld [vmem:[%s4044_s7 + $0x38] sm:$0xff]  ;;  %s3987_s27 = scalar_lea.hbm %s4047_s10, %s2420_s11 }
 0x88d   : > { %v2823_v5 = vpop.eup %2822  ;;  %2648 = vmatpush3.bf16.msra.mxu1 %v2158_v0  ;;  %v2160_v15 = vpack.c.bf16 %v2156_v23, %v2155_v21 }
 0x88e   : > { %v2825_v7 = vpop.eup %2824  ;;  %v661_v22 = vpop.xlane.xlu0 %660  ;;  %v1371_v48 = vmul.f32 %v2823_v5, %v4060_v12  ;;  %2649 = vmatprep.subr.bf16.mxu1 %v2159_v44  ;;  %v1990_v3 = vld [vmem:[#allocation2 + $0x12] sm:$0xff] }
 0x88f   : > { %v1827_v54 = vpop.permute.xlu1 %1826  ;;  %2830 = vrcp.f32 %v661_v22  ;;  %v3601_v13 = vmul.f32 %v2825_v7, %v4061_v4 }
 0x890   : > { %1848 = vst.msk [vmem:[#allocation2 + $0x41] sm:$0xff] %vm383_vm0, %v1827_v54  ;;  %1718 = vrot.lane.b32.xlu1 %v1371_v48, %s2929_s21 }
 0x891   : > { %v2827_v10 = vpop.eup %2826  ;;  %2650 = vmatpush3.bf16.msra.mxu1 %v2159_v44 }
 0x892   : > { %v664_v57 = vpop.xlane.xlu0 %663  ;;  %v3605_v31 = vmul.f32 %v2827_v10, %v4062_v58  ;;  %2651 = vmatprep.subr.bf16.mxu1 %v2160_v15 }
 0x893   : > { %2832 = vrcp.f32 %v664_v57 }
 0x895   : > { %v2829_v25 = vpop.eup %2828  ;;  %2652 = vmatpush3.bf16.msra.mxu1 %v2160_v15  ;;  %v3720_v15 = vld [vmem:[#allocation2 + $0x32] sm:$0xff] }
 0x896   : > { %v1823_v29 = vpop.permute.xlu0 %1822  ;;  %v3608_v34 = vmul.f32 %v2829_v25, %v4063_v27 }
 0x897   : > { %1846 = vst.msk [vmem:[#allocation2 + $0x21] sm:$0xff] %vm383_vm0, %v1823_v29 }
 0x899   : > { %v2831_v18 = vpop.eup %2830 }
 0x89a   : > { %v3612_v19 = vmul.f32 %v2831_v18, %v4064_v33 }
 0x89d   : > { %v2833_v40 = vpop.eup %2832 }
 0x89e   : > { %v3615_v30 = vmul.f32 %v2833_v40, %v4065_v17 }
 0x8bf   : > { %v667_v50 = vpop.xlane.xlu1 %666 }
 0x8c0   : > { %2834 = vrcp.f32 %v667_v50 }
 0x8c3   : > { %v1543_v35 = vpop.xlane.xlu1 %1542 }
 0x8c7   : > { %v1546_v26 = vpop.xlane.xlu0 %1545  ;;  %v1537_v51 = vpop.xlane.xlu1 %1536 }
 0x8ca   : > { %v2835_v6 = vpop.eup %2834 }
 0x8cb   : > { %v1540_v20 = vpop.xlane.xlu0 %1539  ;;  %v1555_v2 = vpop.xlane.xlu1 %1554  ;;  %v3624_v11 = vmul.f32 %v2835_v6, %v4066_v24  ;;  %v3683_v24 = vld [vmem:[#allocation2 + $0x21] sm:$0xff] }
 0x8cf   : > { %v1558_v61 = vpop.xlane.xlu0 %1557  ;;  %v1549_v52 = vpop.xlane.xlu1 %1548 }
 0x8d3   : > { %v1552_v53 = vpop.xlane.xlu0 %1551  ;;  %v1829_v46 = vpop.permute.xlu1 %1828 }
 0x8d4   : > { %1849 = vst.msk [vmem:[#allocation2 + $0x51] sm:$0xff] %vm383_vm0, %v1829_v46 }
 0x8d7   : > { %v670_v45 = vpop.xlane.xlu0 %669  ;;  %v1833_v60 = vpop.permute.xlu1 %1832 }
 0x8d8   : > { %2836 = vrcp.f32 %v670_v45  ;;  %1851 = vst.msk [vmem:[#allocation2 + $0x71] sm:$0xff] %vm383_vm0, %v1833_v60 }
 0x8db   : > { %v673_v63 = vpop.xlane.xlu0 %672  ;;  %v1835_v55 = vpop.permute.xlu1 %1834 }
 0x8dc   : > { %2838 = vrcp.f32 %v673_v63  ;;  %1852 = vst.msk [vmem:[#allocation2 + $0x81] sm:$0xff] %vm383_vm0, %v1835_v55  ;;  %v3694_v63 = vld [vmem:[%s4041_s4 + $0x2] ss:$0 sm:$0xff] }
 0x8dd   : > { %v1903_v55 = vld [vmem:[#allocation2 + $0x2] sm:$0xff] }
 0x8df   : > { %v676_v39 = vpop.xlane.xlu0 %675 }
 0x8e0   : > { %2840 = vrcp.f32 %v676_v39  ;;  %v3696_v39 = vld [vmem:[#allocation2 + $0x30] sm:$0xff] }
 0x8e1   : > { %2842 = vrcp.f32 %v1543_v35 }
 0x8e2   : > { %v2837_v38 = vpop.eup %2836  ;;  %2844 = vrcp.f32 %v1537_v51  ;;  %v3672_v51 = vld [vmem:[%s4041_s4] ss:$0 sm:$0xff] }
 0x8e3   : > { %v1831_v56 = vpop.permute.xlu0 %1830  ;;  %v3630_v41 = vmul.f32 %v2837_v38, %v4067_v62  ;;  %2846 = vrcp.f32 %v1546_v26  ;;  %v3698_v38 = vld [vmem:[#allocation2 + $0x31] sm:$0xff]  ;;  %v1869_v0 = vmul.f32 %v3672_v51, %v3696_v39 }
 0x8e4   : > { %1850 = vst.msk [vmem:[#allocation2 + $0x61] sm:$0xff] %vm383_vm0, %v1831_v56  ;;  %2848 = vrcp.f32 %v1540_v20  ;;  %v1874_v20 = vld [vmem:[#allocation2 + $0x1] sm:$0xff] }
 0x8e5   : > { %2850 = vrcp.f32 %v1555_v2  ;;  %v3681_v2 = vld [vmem:[#allocation2 + $0x20] sm:$0xff] }
 0x8e6   : > { %v2839_v37 = vpop.eup %2838  ;;  %2852 = vrcp.f32 %v1549_v52  ;;  %v3674_v6 = vpop.permute.xlu1 %1676  ;;  %v1961_v52 = vld [vmem:[#allocation2 + $0x11] sm:$0xff]  ;;  %v1868_v45 = vmul.f32 %v3672_v51, %v3681_v2 }
 0x8e7   : > { %v3634_v43 = vmul.f32 %v2839_v37, %v4068_v59  ;;  %2854 = vrcp.f32 %v1558_v61  ;;  %v1932_v61 = vld [vmem:[#allocation2 + $0x10] sm:$0xff]  ;;  %v3704_v59 = vld [vmem:[#allocation2 + $0x22] sm:$0xff] }
 0x8e8   : > { %2856 = vrcp.f32 %v1552_v53  ;;  %v1867_v56 = vmul.f32 %v3672_v51, %v1932_v61  ;;  %v1918_v23 = vmul.f32 %v3694_v63, %v3704_v59 }
 0x8e9   : > { %4069 = vst [vmem:[#allocation15_spill] sm:$0xff] %v3634_v43 }
 0x8ea   : > { %v2841_v28 = vpop.eup %2840  ;;  %v3702_v37 = vpop.permute.xlu1 %1678 }
 0x8eb   : > { %v3637_v8 = vmul.f32 %v2841_v28, %v4070_v42  ;;  %v2843_v9 = vpop.eup %2842  ;;  %v1916_v42 = vmul.f32 %v3694_v63, %v1903_v55  ;;  %v3716_v21 = vpop.permute.xlu0 %1680 }
 0x8ec   : > { %v2845_v7 = vpop.eup %2844 }
 0x8ed   : > { %4071 = vst [vmem:[#allocation7_spill] sm:$0xff] %v3637_v8  ;;  %v2847_v12 = vpop.eup %2846 }
 0x8ee   : > { %v2849_v10 = vpop.eup %2848 }
 0x8ef   : > { %v2851_v29 = vpop.eup %2850 }
 0x8f0   : > { %v2853_v18 = vpop.eup %2852 }
 0x8f1   : > { %v2855_v17 = vpop.eup %2854 }
 0x8f2   : > { %v2857_v36 = vpop.eup %2856 }
 0x916   : > { %v2639_v5 = vpop.f32.mrb[24].mxu1 }
 0x917   : > { %v1662_v22 = vmul.f32 %v2843_v9, %v2639_v5  ;;  %v1629_v54 = vpop.f32.mrb[25].mxu1  ;;  %v1945_v5 = vmul.f32 %v3710_v16, %v1932_v61 }
 0x918   : > { %v1660_v48 = vmul.f32 %v2845_v7, %v1629_v54  ;;  %v2640_v4 = vpop.f32.mrb[26].mxu1  ;;  %v1917_v7 = vmul.f32 %v3694_v63, %v1990_v3  ;;  %v3726_v54 = vpop.permute.xlu1 %1682 }
 0x919   : > { %v1663_v57 = vmul.f32 %v2847_v12, %v2640_v4  ;;  %v1632_v58 = vpop.f32.mrb[27].mxu1  ;;  %1744 = vrot.lane.b32.xlu0 %v1662_v22, %s2926_s12  ;;  %v1946_v22 = vmul.f32 %v3710_v16, %v3681_v2  ;;  %v2022_v4 = vld [vmem:[#allocation2 + $0x40] sm:$0xff] }
 0x91a   : > { %v1661_v25 = vmul.f32 %v2849_v10, %v1632_v58  ;;  %v3733_v58 = vld [vmem:[%s4041_s4 + $0x4] ss:$0 sm:$0xff] }
 0x91b   : > { %1746 = vrot.lane.b32.xlu1 %v1663_v57, %s2926_s12  ;;  %v1947_v57 = vmul.f32 %v3710_v16, %v3696_v39 }
 0x91d   : > { %1740 = vrot.lane.b32.xlu0 %v1660_v48, %s2926_s12 }
 0x91e   : > { %v2643_v27 = vpop.f32.mrb[28].mxu1 }
 0x91f   : > { %v1666_v33 = vmul.f32 %v2851_v29, %v2643_v27  ;;  %v1645_v40 = vpop.f32.mrb[29].mxu1  ;;  %1742 = vrot.lane.b32.xlu1 %v1661_v25, %s2926_s12  ;;  %v1919_v25 = vmul.f32 %v3694_v63, %v3720_v15  ;;  %v3740_v29 = vld [vmem:[%s4041_s4 + $0x5] ss:$0 sm:$0xff] }
 0x920   : > { %v1664_v47 = vmul.f32 %v2853_v18, %v1645_v40  ;;  %v2644_v49 = vpop.f32.mrb[30].mxu1  ;;  %v2003_v61 = vmul.f32 %v3740_v29, %v1990_v3 }
 0x921   : > { %v1667_v50 = vmul.f32 %v2855_v17, %v2644_v49  ;;  %v1648_v35 = vpop.f32.mrb[31].mxu1  ;;  %1720 = vrot.lane.b32.xlu0 %v3594_v1, %s2929_s21  ;;  %v3679_v1 = vld [vmem:[%s4041_s4 + $0x1] ss:$0 sm:$0xff]  ;;  %v2023_v49 = vld [vmem:[#allocation2 + $0x50] sm:$0xff] }
 0x922   : > { %v1665_v26 = vmul.f32 %v2857_v36, %v1648_v35  ;;  %v1887_v46 = vmul.f32 %v3679_v1, %v1874_v20  ;;  %v1889_v60 = vmul.f32 %v3679_v1, %v3683_v24  ;;  %v1888_v62 = vmul.f32 %v3679_v1, %v1961_v52  ;;  %v3745_v36 = vld [vmem:[#allocation2 + $0x51] sm:$0xff]  ;;  %v2051_v20 = vld [vmem:[#allocation2 + $0x41] sm:$0xff] }
 0x923   : > { %1722 = vrot.lane.b32.xlu1 %v3605_v31, %s2929_s21  ;;  %v1853_v31 = vld [vmem:[#allocation2] sm:$0xff]  ;;  %v1890_v32 = vmul.f32 %v3679_v1, %v3698_v38  ;;  %v1975_v35 = vmul.f32 %v3733_v58, %v3683_v24  ;;  %v1892_v3 = vmul.f32 %v3679_v1, %v3745_v36 }
 0x924   : > { %v1866_v53 = vmul.f32 %v3672_v51, %v1853_v31  ;;  %v1897_v14 = vadd.f32 %v1889_v60, %v1868_v45  ;;  %v1896_v44 = vadd.f32 %v1888_v62, %v1867_v56  ;;  %v1976_v31 = vmul.f32 %v3733_v58, %v3698_v38  ;;  %v3767_v62 = vld [vmem:[#allocation2 + $0x60] sm:$0xff] }
 0x925   : > { %1748 = vrot.lane.b32.xlu0 %v1664_v47, %s2926_s12  ;;  %v1898_v48 = vadd.f32 %v1890_v32, %v1869_v0  ;;  %v1948_v47 = vmul.f32 %v3710_v16, %v2022_v4  ;;  %v2005_v45 = vmul.f32 %v3740_v29, %v3720_v15  ;;  %v1870_v56 = vmul.f32 %v3672_v51, %v2022_v4 }
 0x926   : > { %v1895_v28 = vadd.f32 %v1887_v46, %v1866_v53  ;;  %v1926_v12 = vadd.f32 %v1918_v23, %v1897_v14  ;;  %v1925_v10 = vadd.f32 %v1917_v7, %v1896_v44  ;;  %v3755_v53 = vld [vmem:[#allocation2 + $0x70] sm:$0xff]  ;;  %v3774_v14 = vld [vmem:[%s4041_s4 + $0x7] ss:$0 sm:$0xff]  ;;  %v1871_v32 = vmul.f32 %v3672_v51, %v2023_v49 }
 0x927   : > { %1750 = vrot.lane.b32.xlu1 %v1665_v26, %s2926_s12  ;;  %v1927_v17 = vadd.f32 %v1919_v25, %v1898_v48  ;;  %v3750_v26 = vpop.permute.xlu1 %1710  ;;  %v3757_v46 = vld [vmem:[#allocation2 + $0x71] sm:$0xff]  ;;  %v2004_v44 = vmul.f32 %v3740_v29, %v3704_v59  ;;  %v1891_v23 = vmul.f32 %v3679_v1, %v2051_v20 }
 0x928   : > { %v1924_v9 = vadd.f32 %v1916_v42, %v1895_v28  ;;  %v1954_v18 = vadd.f32 %v1946_v22, %v1925_v10  ;;  %v1955_v40 = vadd.f32 %v1947_v57, %v1926_v12  ;;  %v3769_v28 = vld [vmem:[#allocation2 + $0x61] sm:$0xff]  ;;  %v1977_v12 = vmul.f32 %v3733_v58, %v2051_v20  ;;  %v3795_v25 = vld [vmem:[#allocation2 + $0x52] sm:$0xff] }
 0x929   : > { %1752 = vrot.lane.b32.xlu0 %v1666_v33, %s2926_s12  ;;  %v3742_v33 = vpop.permute.xlu0 %1708  ;;  %v1956_v0 = vadd.f32 %v1948_v47, %v1927_v17  ;;  %v2080_v22 = vld [vmem:[#allocation2 + $0x42] sm:$0xff]  ;;  %v1872_v10 = vmul.f32 %v3672_v51, %v3767_v62  ;;  %v1893_v57 = vmul.f32 %v3679_v1, %v3769_v28  ;;  %v2063_v17 = vmul.f32 %v3774_v14, %v3698_v38 }
 0x92a   : > { %v1953_v27 = vadd.f32 %v1945_v5, %v1924_v9  ;;  %v1983_v55 = vadd.f32 %v1975_v35, %v1954_v18  ;;  %v1984_v42 = vadd.f32 %v1976_v31, %v1955_v40  ;;  %v1873_v9 = vmul.f32 %v3672_v51, %v3755_v53  ;;  %v3804_v31 = vld [vmem:[#allocation2 + $0x72] sm:$0xff] }
 0x92b   : > { %1754 = vrot.lane.b32.xlu1 %v1667_v50, %s2926_s12  ;;  %v1974_v50 = vmul.f32 %v3733_v58, %v1961_v52  ;;  %v3764_v52 = vld [vmem:[%s4041_s4 + $0x6] ss:$0 sm:$0xff]  ;;  %v1894_v5 = vmul.f32 %v3679_v1, %v3757_v46  ;;  %v3801_v47 = vpop.permute.xlu1 %1714  ;;  %v1985_v35 = vadd.f32 %v1977_v12, %v1956_v0  ;;  %v1900_v51 = vadd.f32 %v1892_v3, %v1871_v32  ;;  %s2862_s12 = sshll.u32 %s2934_s29, 4  ;;  %s2863_s12 = int_to_ptr.vmem [resolvable:$false] %s2862_s12 }
 0x92c   : > { %v2034_v48 = vmul.f32 %v3764_v52, %v3696_v39  ;;  %v2033_v18 = vmul.f32 %v3764_v52, %v3681_v2  ;;  %v2012_v40 = vadd.f32 %v2004_v44, %v1983_v55  ;;  %v2035_v39 = vmul.f32 %v3764_v52, %v2022_v4  ;;  %s2864_s21 = scalar_lea.vmem %s2863_s12, 2048  ;;  %p2865_p0 = scmp.lt.s32.totalorder %s3989_s18, %s2863_s12 }
 0x92d   : > { %v1982_v60 = vadd.f32 %v1974_v50, %v1953_v27  ;;  %v3786_v7 = vpop.permute.xlu0 %1712  ;;  %v2013_v50 = vadd.f32 %v2005_v45, %v1984_v42  ;;  %v2006_v1 = vmul.f32 %v3740_v29, %v2080_v22  ;;  %v1899_v8 = vadd.f32 %v1891_v23, %v1870_v56  ;;  %v3815_v42 = vld [vmem:[#allocation2 + $0x80] sm:$0xff]  ;;  %p2866_p1 = scmp.lt.s32.totalorder %s2864_s21, %s2858_s28 }
 0x92e   : > { %v1902_v2 = vadd.f32 %v1894_v5, %v1873_v9  ;;  %v2036_v55 = vmul.f32 %v3764_v52, %v2023_v49  ;;  %v1921_v38 = vmul.f32 %v3694_v63, %v3795_v25  ;;  %v1950_v4 = vmul.f32 %v3710_v16, %v3767_v62 }
 0x92f   : > { %v2011_v27 = vadd.f32 %v2003_v61, %v1982_v60  ;;  %v1920_v61 = vmul.f32 %v3694_v63, %v2080_v22  ;;  %v3808_v60 = vld [vmem:[#allocation2 + $0x62] sm:$0xff]  ;;  %v1901_v45 = vadd.f32 %v1893_v57, %v1872_v10  ;;  %v2042_v32 = vadd.f32 %v2034_v48, %v2012_v40  ;;  %p2867_p2 = por %p2866_p1, %p2865_p0 }
 0x930   : > { %v1949_v56 = vmul.f32 %v3710_v16, %v2023_v49  ;;  %v1923_v3 = vmul.f32 %v3694_v63, %v3804_v31  ;;  %v2043_v23 = vadd.f32 %v2035_v39, %v2013_v50  ;;  %v2014_v9 = vadd.f32 %v2006_v1, %v1985_v35  ;;  %v3828_v49 = vpop.permute.xlu1 %1686 }
 0x931   : > { %v2041_v0 = vadd.f32 %v2033_v18, %v2011_v27  ;;  %v3820_v44 = vpop.permute.xlu0 %1684  ;;  %v1929_v5 = vadd.f32 %v1921_v38, %v1900_v51  ;;  %v1922_v12 = vmul.f32 %v3694_v63, %v3808_v60  ;;  %v2062_v10 = vmul.f32 %v3774_v14, %v3683_v24  ;;  %v3834_v18 = vld [vmem:[%s4041_s4 + $0x8] ss:$0 sm:$0xff]  ;;  %p2868_p3 = pnand %p2867_p2, %p2861_p13 }
 0x932   : > { %v1928_v57 = vadd.f32 %v1920_v61, %v1899_v8  ;;  %v1931_v43 = vadd.f32 %v1923_v3, %v1902_v2  ;;  %v1952_v48 = vmul.f32 %v3710_v16, %v3815_v42  ;;  %v2064_v27 = vmul.f32 %v3774_v14, %v2051_v20  ;;  %v3842_v61 = vld [vmem:[#allocation2 + $0x81] sm:$0xff] }
 0x933   : > { %v2044_v40 = vadd.f32 %v2036_v55, %v2014_v9  ;;  %v1958_v50 = vadd.f32 %v1950_v4, %v1929_v5  ;;  %v1930_v63 = vadd.f32 %v1922_v12, %v1901_v45  ;;  %v2070_v39 = vadd.f32 %v2062_v10, %v2041_v0  ;;  %v3868_v12 = vld [vmem:[#allocation2 + $0x82] sm:$0xff] }
 0x934   : > { %v2071_v35 = vadd.f32 %v2063_v17, %v2042_v32  ;;  %v1957_v24 = vadd.f32 %v1949_v56, %v1928_v57  ;;  %v2072_v8 = vadd.f32 %v2064_v27, %v2043_v23  ;;  %v2065_v51 = vmul.f32 %v3774_v14, %v3745_v36  ;;  %v3855_v9 = vpop.permute.xlu1 %1690  ;;  %v2027_v27 = vld [vmem:[#allocation2 + $0x90] sm:$0xff] }
 0x935   : > { %v1979_v1 = vmul.f32 %v3733_v58, %v3769_v28  ;;  %v1951_v20 = vmul.f32 %v3710_v16, %v3755_v53  ;;  %v2091_v2 = vmul.f32 %v3834_v18, %v3704_v59  ;;  %v2092_v55 = vmul.f32 %v3834_v18, %v3720_v15  ;;  %v3850_v4 = vpop.permute.xlu0 %1688 }
 0x936   : > { %v1978_v17 = vmul.f32 %v3733_v58, %v3745_v36  ;;  %v1960_v38 = vadd.f32 %v1952_v48, %v1931_v43  ;;  %v2093_v45 = vmul.f32 %v3834_v18, %v2080_v22  ;;  %v2073_v0 = vadd.f32 %v2065_v51, %v2044_v40  ;;  %v3860_v43 = vld [vmem:[%s4042_s5] ss:$0 sm:$0xff] }
 0x937   : > { %v1987_v32 = vadd.f32 %v1979_v1, %v1958_v50  ;;  %v1959_v56 = vadd.f32 %v1951_v20, %v1930_v63  ;;  %v2099_v16 = vadd.f32 %v2091_v2, %v2070_v39  ;;  %v2100_v3 = vadd.f32 %v2092_v55, %v2071_v35  ;;  %v2056_v39 = vld [vmem:[#allocation2 + $0x91] sm:$0xff]  ;;  %v3884_v1 = vld [vmem:[%s4043_s6] ss:$0 sm:$0xff] }
 0x938   : > { %v1986_v23 = vadd.f32 %v1978_v17, %v1957_v24  ;;  %v1981_v59 = vmul.f32 %v3733_v58, %v3842_v61  ;;  %v2101_v15 = vadd.f32 %v2093_v45, %v2072_v8  ;;  %v2094_v36 = vmul.f32 %v3834_v18, %v3795_v25  ;;  %v2085_v35 = vld [vmem:[#allocation2 + $0x92] sm:$0xff] }
 0x939   : > { %v2008_v22 = vmul.f32 %v3740_v29, %v3808_v60  ;;  %v1980_v5 = vmul.f32 %v3733_v58, %v3757_v46  ;;  %v2037_v10 = vmul.f32 %v3764_v52, %v3767_v62  ;;  %v2007_v57 = vmul.f32 %v3740_v29, %v3795_v25  ;;  %v3878_v62 = vpop.permute.xlu0 %1716 }
 0x93a   : > { %v1989_v48 = vadd.f32 %v1981_v59, %v1960_v38  ;;  %v2102_v40 = vadd.f32 %v2094_v36, %v2073_v0  ;;  %v2114_v24 = vmul.f32 %v3860_v43, %v2099_v16  ;;  %v2115_v58 = vmul.f32 %v3860_v43, %v2100_v3 }
 0x93b   : > { %v2016_v50 = vadd.f32 %v2008_v22, %v1987_v32  ;;  %v1988_v63 = vadd.f32 %v1980_v5, %v1959_v56  ;;  %v2015_v8 = vadd.f32 %v2007_v57, %v1986_v23  ;;  %v2010_v51 = vmul.f32 %v3740_v29, %v3868_v12  ;;  %v1719_v32 = vpop.permute.xlu1 %1718 }
 0x93c   : > { %v2116_v25 = vmul.f32 %v3860_v43, %v2101_v15  ;;  %v2038_v20 = vmul.f32 %v3764_v52, %v3755_v53  ;;  %v2009_v2 = vmul.f32 %v3740_v29, %v3804_v31  ;;  %v2040_v55 = vmul.f32 %v3764_v52, %v2027_v27 }
 0x93d   : > { %v2045_v17 = vadd.f32 %v2037_v10, %v2015_v8  ;;  %v2018_v38 = vadd.f32 %v2010_v51, %v1989_v48  ;;  %v2069_v45 = vmul.f32 %v3774_v14, %v2056_v39  ;;  %v2098_v0 = vmul.f32 %v3834_v18, %v2085_v35 }
 0x93e   : > { %v2117_v56 = vmul.f32 %v3860_v43, %v2102_v40  ;;  %v2046_v16 = vadd.f32 %v2038_v20, %v2016_v50  ;;  %v2017_v3 = vadd.f32 %v2009_v2, %v1988_v63  ;;  %v1767_v53 = vsel %vm1764_vm3, %v3612_v19, %v3716_v21 }
 0x93f   : > { %v2129_v29 = vadd.f32 %v3884_v1, %v2114_v24  ;;  %v2130_v23 = vadd.f32 %v3884_v1, %v2115_v58  ;;  %v2066_v59 = vmul.f32 %v3774_v14, %v3769_v28  ;;  %v1776_v15 = vsel %vm1773_vm4, %v1767_v53, %v3786_v7 }
 0x940   : > { %v2131_v36 = vadd.f32 %v3884_v1, %v2116_v25  ;;  %v2067_v5 = vmul.f32 %v3774_v14, %v3757_v46  ;;  %v2039_v10 = vmul.f32 %v3764_v52, %v3815_v42  ;;  %v1768_v19 = vsel %vm1764_vm3, %v3615_v30, %v3726_v54 }
 0x941   : > { %v2074_v57 = vadd.f32 %v2066_v59, %v2045_v17  ;;  %v2048_v28 = vadd.f32 %v2040_v55, %v2018_v38  ;;  %v1777_v7 = vsel %vm1773_vm4, %v1768_v19, %v3801_v47  ;;  %v2132_v48 = vadd.f32 %v3884_v1, %v2117_v56 }
 0x942   : > { %v2075_v40 = vadd.f32 %v2067_v5, %v2046_v16  ;;  %v2047_v50 = vadd.f32 %v2039_v10, %v2017_v3  ;;  %v1765_v46 = vsel %vm1764_vm3, %v3601_v13, %v3674_v6  ;;  %v2095_v30 = vmul.f32 %v3834_v18, %v3808_v60 }
 0x943   : > { %v2096_v54 = vmul.f32 %v3834_v18, %v3804_v31  ;;  %v1774_v47 = vsel %vm1773_vm4, %v1765_v46, %v3742_v33  ;;  %v2068_v35 = vmul.f32 %v3774_v14, %v3842_v61  ;;  %v1766_v13 = vsel %vm1764_vm3, %v3608_v34, %v3702_v37 }
 0x944   : > { %v2103_v24 = vadd.f32 %v2095_v30, %v2074_v57  ;;  %v2077_v60 = vadd.f32 %v2069_v45, %v2048_v28  ;;  %v1775_v31 = vsel %vm1773_vm4, %v1766_v13, %v3750_v26  ;;  %v2097_v61 = vmul.f32 %v3834_v18, %v3868_v12 }
 0x945   : > { %v2104_v33 = vadd.f32 %v2096_v54, %v2075_v40  ;;  %v2076_v51 = vadd.f32 %v2068_v35, %v2047_v50  ;;  %v1769_v45 = vsel %vm1764_vm3, %v3624_v11, %v3820_v44  ;;  %v1770_v18 = vsel %vm1764_vm3, %v3630_v41, %v3828_v49 }
 0x946   : > { %v2118_v34 = vmul.f32 %v3860_v43, %v2103_v24  ;;  %v2106_v26 = vadd.f32 %v2098_v0, %v2077_v60  ;;  %v1778_v56 = vsel %vm1773_vm4, %v1769_v45, %v3878_v62  ;;  %v1779_v0 = vsel %vm1773_vm4, %v1770_v18, %v1719_v32  ;;  %v4073_v32 = vld [vmem:[#allocation7_spill] sm:$0xff] }
 0x947   : > { %v2119_v17 = vmul.f32 %v3860_v43, %v2104_v33  ;;  %v2105_v38 = vadd.f32 %v2097_v61, %v2076_v51 }
 0x948   : > { %v2133_v3 = vadd.f32 %v3884_v1, %v2118_v34  ;;  %v2121_v53 = vmul.f32 %v3860_v43, %v2106_v26 }
 0x949   : > { %v2134_v11 = vadd.f32 %v3884_v1, %v2119_v17  ;;  %v2120_v62 = vmul.f32 %v3860_v43, %v2105_v38 }
 0x94a   : > { %v2136_v19 = vadd.f32 %v3884_v1, %v2121_v53 }
 0x98b   : > { %v1745_v22 = vpop.permute.xlu0 %1744 }
 0x98c   : > { %v1785_v21 = vsel %vm1782_vm5, %v1776_v15, %v1745_v22  ;;  %v1772_v22 = vsel %vm1764_vm3, %v4073_v32, %v3855_v9  ;;  %v2412_v9 = vld [vmem:[%s4045_s8] ss:$0 sm:$0xff] }
 0x98d   : > { %v1747_v27 = vpop.permute.xlu1 %1746  ;;  %v2139_v42 = vadd.f32 %v2131_v36, %v1785_v21 }
 0x98e   : > { %v1786_v52 = vsel %vm1782_vm5, %v1777_v7, %v1747_v27 }
 0x98f   : > { %v2140_v63 = vadd.f32 %v2132_v48, %v1786_v52  ;;  %v1741_v39 = vpop.permute.xlu0 %1740 }
 0x990   : > { %v1783_v6 = vsel %vm1782_vm5, %v1774_v47, %v1741_v39 }
 0x991   : > { %v2146_v58 = vpack.c.bf16 %v2140_v63, %v2139_v42  ;;  %v1743_v8 = vpop.permute.xlu1 %1742  ;;  %v2137_v20 = vadd.f32 %v2129_v29, %v1783_v6  ;;  %v4072_v29 = vld [vmem:[#allocation15_spill] sm:$0xff] }
 0x992   : > { %v1784_v25 = vsel %vm1782_vm5, %v1775_v31, %v1743_v8 }
 0x993   : > { %v2138_v2 = vadd.f32 %v2130_v23, %v1784_v25  ;;  %v1721_v14 = vpop.permute.xlu0 %1720  ;;  %v1771_v23 = vsel %vm1764_vm3, %v4072_v29, %v3850_v4  ;;  %v2135_v4 = vadd.f32 %v3884_v1, %v2120_v62  ;;  %v2413_v1 = vld [vmem:[%s4046_s9] ss:$0 sm:$0xff] }
 0x994   : > { %v1780_v49 = vsel %vm1773_vm4, %v1771_v23, %v1721_v14 }
 0x995   : > { %v2145_v37 = vpack.c.bf16 %v2138_v2, %v2137_v20  ;;  %v1723_v55 = vpop.permute.xlu1 %1722 }
 0x996   : > { %v1781_v43 = vsel %vm1773_vm4, %v1772_v22, %v1723_v55 }
 0x997   : > { %v1749_v16 = vpop.permute.xlu0 %1748  ;;  %2653 = vmatprep.mubr.msk.bf16.mxu1 %vm383_vm0, %v2145_v37 }
 0x998   : > { %v1787_v12 = vsel %vm1782_vm5, %v1778_v56, %v1749_v16  ;;  %2654 = vmatmul.mubr.msk.bf16.vlgmr.msra.gmra.mrb[32].mxu1 %vm383_vm0, %v2146_v58 }
 0x999   : > { %v1751_v44 = vpop.permute.xlu1 %1750  ;;  %v2141_v59 = vadd.f32 %v2133_v3, %v1787_v12 }
 0x99a   : > { %v1788_v41 = vsel %vm1782_vm5, %v1779_v0, %v1751_v44 }
 0x99b   : > { %v2142_v15 = vadd.f32 %v2134_v11, %v1788_v41  ;;  %v1753_v36 = vpop.permute.xlu0 %1752 }
 0x99c   : > { %v1789_v5 = vsel %vm1782_vm5, %v1780_v49, %v1753_v36 }
 0x99d   : > { %v2147_v10 = vpack.c.bf16 %v2142_v15, %v2141_v59  ;;  %v1755_v21 = vpop.permute.xlu1 %1754  ;;  %v2143_v28 = vadd.f32 %v2135_v4, %v1789_v5 }
 0x99e   : > { %v1790_v57 = vsel %vm1782_vm5, %v1781_v43, %v1755_v21 }
 0x99f   : > { %v2144_v7 = vadd.f32 %v2136_v19, %v1790_v57  ;;  %2657 = vmatprep.mubr.msk.bf16.mxu1 %vm383_vm0, %v2147_v10 }
 0x9a1   : > { %v2148_v48 = vpack.c.bf16 %v2144_v7, %v2143_v28 }
 0x9a3   : > { %2658 = vmatmul.mubr.msk.bf16.gmra.mrb[36].mxu1 %vm383_vm0, %v2148_v48 }
 0xa6b   : > { %v2655_v27 = vpop.f32.mrb[32].mxu1 }
 0xa6c   : > { %v2247_v40 = vmul.f32 %v2655_v27, %v2412_v9  ;;  %v2207_v50 = vpop.f32.mrb[33].mxu1 }
 0xa6d   : > { %v2245_v46 = vmul.f32 %v2412_v9, %v2207_v50  ;;  %v2656_v52 = vpop.f32.mrb[34].mxu1 }
 0xa6e   : > { %v2262_v30 = vadd.f32 %v2413_v1, %v2247_v40  ;;  %v2248_v54 = vmul.f32 %v2656_v52, %v2412_v9  ;;  %v2210_v47 = vpop.f32.mrb[35].mxu1 }
 0xa6f   : > { %v2260_v42 = vadd.f32 %v2413_v1, %v2245_v46  ;;  %v2246_v63 = vmul.f32 %v2412_v9, %v2210_v47 }
 0xa70   : > { %2270 = vst.msk [vmem:[%s352_s30 + $0x10] sm:$0xff] %vm383_vm0, %v2262_v30  ;;  %v2263_v39 = vadd.f32 %v2413_v1, %v2248_v54 }
 0xa71   : > { %2268 = vst.msk [vmem:[%s352_s30] sm:$0xff] %vm383_vm0, %v2260_v42  ;;  %v2261_v35 = vadd.f32 %v2413_v1, %v2246_v63 }
 0xa72   : > { %2271 = vst.msk [vmem:[%s352_s30 + $0x18] sm:$0xff] %vm383_vm0, %v2263_v39 }
 0xa73   : > { %2269 = vst.msk [vmem:[%s352_s30 + $0x8] sm:$0xff] %vm383_vm0, %v2261_v35 }
 0xa76   : > { %v2659_v13 = vpop.f32.mrb[36].mxu1 }
 0xa77   : > { %v2251_v6 = vmul.f32 %v2659_v13, %v2412_v9  ;;  %v2223_v24 = vpop.f32.mrb[37].mxu1 }
 0xa78   : > { %v2249_v60 = vmul.f32 %v2412_v9, %v2223_v24  ;;  %v2660_v31 = vpop.f32.mrb[38].mxu1 }
 0xa79   : > { %v2266_v58 = vadd.f32 %v2413_v1, %v2251_v6  ;;  %v2252_v8 = vmul.f32 %v2660_v31, %v2412_v9  ;;  %v2226_v33 = vpop.f32.mrb[39].mxu1 }
 0xa7a   : > { %v2264_v51 = vadd.f32 %v2413_v1, %v2249_v60  ;;  %v2250_v25 = vmul.f32 %v2412_v9, %v2226_v33 }
 0xa7b   : > { %2274 = vst.msk [vmem:[%s352_s30 + $0x30] sm:$0xff] %vm383_vm0, %v2266_v58  ;;  %v2267_v20 = vadd.f32 %v2413_v1, %v2252_v8 }
 0xa7c   : > { %2272 = vst.msk [vmem:[%s352_s30 + $0x20] sm:$0xff] %vm383_vm0, %v2264_v51  ;;  %v2265_v2 = vadd.f32 %v2413_v1, %v2250_v25 }
 0xa7d   : > { %2275 = vst.msk [vmem:[%s352_s30 + $0x38] sm:$0xff] %vm383_vm0, %v2267_v20 }
 0xa7e   : > { %2273 = vst.msk [vmem:[%s352_s30 + $0x28] sm:$0xff] %vm383_vm0, %v2265_v2 }
 0xa7f   : > { %2871 = shalt.err (!%p2868_p3)
}
 0xa80   : > { %s2872_s26 = scalar_lea.hbm %s3987_s27, 1024  ;;  %s2876_s20 = scalar_lea.hbm %s4047_s10, 2048 }
 0xa81   : > { %p2873_p4 = scmp.ne.s32.totalorder %s3987_s27, %s2872_s26  ;;  %p2877_p9 = scmp.lt.u32.totalorder %s3987_s27, %s4047_s10 }
 0xa82   : > { %p2878_p10 = scmp.lt.u32.totalorder %s2876_s20, %s2872_s26  ;;  %p2880_p12 = scmp.lt.u32.totalorder %s2872_s26, %s3987_s27 }
 0xa83   : > { %p2874_p7 = pnand %p2873_p4, %p3030_p5 }
 0xa84   : > { %p2879_p11 = por %p2878_p10, %p2877_p9 }
 0xa85   : > { %p2875_p8 = pneg %p2874_p7 }
 0xa86   : > { %p2881_p13 = por %p2880_p12, %p2879_p11 }
 0xa88   : > { %p2882_p0 = pnand %p2881_p13, %p2875_p8 }
 0xa8a   : > { %2885 = shalt.err (!%p2882_p0)
}
 0xa8b   : > { %s2935_s28 = smov 128   ;;  %s2936_s12 = smov 8  }
 0xa8c   : > { %2677 = dma.vmem_to_hbm [thread:$0]  (%p3030_p5), %s3989_s18, 1024, %s3987_s27, %s3996_s17, %s2935_s28, %s2935_s28, %s2936_s12  }
 0xa8d PF: > { %p2683_p1 = scmp.ge.s32.totalorder %s2920_s16, 2  ;;  %s2305_s21 = sand.u32 1, %s2908_s13  }
 0xa8e   : > { %s2306_s26 = scalar_lea.sflag [#allocation4], %s2305_s21 }
 0xa8f   : > { %p2680_p2 = pnand %p2683_p1, %p3034_p6 }
 0xa91   : > { %2903 = dma.done.wait (!%p2680_p2), %s2306_s26, 1024  }
 0xa92   : > { %2905 = vsyncadd (!%p2680_p2), %s2306_s26, 4294966272  ;;  %p20_p3 = scmp.ge.s32.totalorder %s3017_s19, 4   ;;  %s4074_s13 = smov %s2912_s14 }
 0xa93   : > { %s4075_s14 = smov %s2916_s15  ;;  %s4076_s15 = smov %s3028_s22 }
 0xa94   : > { %s4077_s16 = smov %s3017_s19  ;;  %22 = sbr.rel (!%p20_p3) target bundleno = 3 (0x3), region = 97 }
 0xa9b   :  { %2311 = vsyncpa [#allocation4], 1 }
 0xa9c   :  { %2313 = vsyncpa [#allocation4 + $0x1], 1 }

</bundles_post_ra>
